<compile_context>
chip_gen: v7x
topology: tpu7x:2x2x1
jax: 0.10.0
libtpu: 0.0.40
codegen_flags: <defaults>
</compile_context>

<pallas_src>
import math
import functools

import jax
import jax.numpy as jnp
from jax.experimental import pallas as pl
from jax.experimental.pallas import tpu as pltpu


# ----------------------------------------------------------------------------
# Kernels
# ----------------------------------------------------------------------------
def _project_kernel(x_ref, w_ref, d_ref):
    """D[p, i-tile] = x_tile @ W[p]   (small (TM,Cin)@(Cin,Coutp) matmul)."""
    d_ref[...] = jnp.dot(
        x_ref[...].astype(jnp.bfloat16),
        w_ref[...].astype(jnp.bfloat16),
        preferred_element_type=jnp.float32,
    )


def _horner_step_kernel(adj_ref, r_ref, d_ref, o_ref, acc_ref, *, apply_relu):
    """out = adj @ r + d  (tiled over rows x contraction), relu on final step.

    adj_ref: (TM, TK) bf16     r_ref: (TK, Coutp) f32     d_ref: (TM, Coutp) f32
    o_ref:   (TM, Coutp) f32   acc_ref: VMEM (TM, Coutp) f32 accumulator
    """
    k = pl.program_id(1)

    @pl.when(k == 0)
    def _():
        acc_ref[...] = jnp.zeros_like(acc_ref)

    acc_ref[...] += jnp.dot(
        adj_ref[...],                          # already bf16 in HBM
        r_ref[...].astype(jnp.bfloat16),       # bf16 MXU operand, f32 accumulate
        preferred_element_type=jnp.float32,
    )

    @pl.when(k == pl.num_programs(1) - 1)
    def _():
        res = acc_ref[...] + d_ref[...]        # full reduction done -> add coeff
        if apply_relu:                         # relu ONLY after full reduction
            res = jnp.maximum(res, 0.0)
        o_ref[...] = res.astype(o_ref.dtype)


# ----------------------------------------------------------------------------
# pallas_call wrappers
# ----------------------------------------------------------------------------
def _round_up(v, m):
    return (v + m - 1) // m * m


def _pick_node_tiles(n):
    """Node-dim padding + tile sizes that satisfy the (8,128) layout rule."""
    if n >= 1024:
        tm = tk = 256          # bigger tiles amortize pipeline overhead (v6e),
    elif n >= 128:             # still well inside v7x's 64 MiB VMEM
        tm = tk = 128
    else:
        tm = tk = _round_up(n, 8)   # tiny graph: one (full-dim) block
    n_pad = _round_up(n, tm)
    return n_pad, tm, tk


def _project(x_pad, w_stack, tm):
    """D = einsum('nc,pcd->pnd', x_pad, w_stack) as a tiled Pallas kernel."""
    n_coeff, c_in, c_out_p = w_stack.shape
    n_pad = x_pad.shape[0]
    return pl.pallas_call(
        _project_kernel,
        out_shape=jax.ShapeDtypeStruct((n_coeff, n_pad, c_out_p), jnp.float32),
        grid_spec=pltpu.PrefetchScalarGridSpec(
            num_scalar_prefetch=0,
            grid=(n_coeff, n_pad // tm),
            in_specs=[
                pl.BlockSpec((tm, c_in), lambda p, i: (i, 0)),
                pl.BlockSpec((None, c_in, c_out_p), lambda p, i: (p, 0, 0)),
            ],
            out_specs=pl.BlockSpec((None, tm, c_out_p), lambda p, i: (p, i, 0)),
        ),
        compiler_params=pltpu.CompilerParams(
            dimension_semantics=("arbitrary", "parallel"),
            vmem_limit_bytes=32 * 1024 * 1024,
        ),
    )(x_pad, w_stack)


def _horner_step(adj_bf16, r, d_k, *, tm, tk, apply_relu):
    """One propagation step: out = adj @ r + d_k (relu on the final step)."""
    n_pad = adj_bf16.shape[0]
    c_out_p = r.shape[-1]
    return pl.pallas_call(
        functools.partial(_horner_step_kernel, apply_relu=apply_relu),
        out_shape=jax.ShapeDtypeStruct((n_pad, c_out_p), jnp.float32),
        grid_spec=pltpu.PrefetchScalarGridSpec(
            num_scalar_prefetch=0,
            grid=(n_pad // tm, n_pad // tk),           # reduction axis last
            in_specs=[
                pl.BlockSpec((tm, tk), lambda i, k: (i, k)),        # adj tile
                pl.BlockSpec((tk, c_out_p), lambda i, k: (k, 0)),   # r tile
                pl.BlockSpec((tm, c_out_p), lambda i, k: (i, 0)),   # D[k] tile
            ],
            out_specs=pl.BlockSpec((tm, c_out_p), lambda i, k: (i, 0)),
            scratch_shapes=[pltpu.VMEM((tm, c_out_p), jnp.float32)],
        ),
        compiler_params=pltpu.CompilerParams(
            dimension_semantics=("parallel", "arbitrary"),
            vmem_limit_bytes=32 * 1024 * 1024,
        ),
    )(adj_bf16, r, d_k)


@functools.partial(jax.jit, static_argnames=("powers",))
def graph_conv_forward(x, adj, weights, powers=(1,)):
    """x: (N, Cin), adj: (N, N), weights: (P, Cin, Cout) -> relu(sum_p adj^p x W_p)."""
    n, c_in = x.shape
    c_out = weights.shape[-1]
    maxp = max(powers)

    n_pad, tm, tk = _pick_node_tiles(n)
    c_out_p = _round_up(c_out, 128)            # lane-dense output stores

    # Zero-pad: padded rows/cols/channels contribute exactly zero, sliced off below.
    x_pad = jnp.zeros((n_pad, c_in), jnp.float32).at[:n].set(x.astype(jnp.float32))
    adj_pad = jnp.zeros((n_pad, n_pad), jnp.float32).at[:n, :n].set(
        adj.astype(jnp.float32))
    adj_bf16 = adj_pad.astype(jnp.bfloat16)    # halve adj HBM traffic; MXU is bf16-native

    # Horner coefficient table: W_stack[k] = sum of kernels whose power == k.
    w_stack = jnp.zeros((maxp + 1, c_in, c_out_p), jnp.float32)
    for i, p in enumerate(powers):
        w_stack = w_stack.at[p, :, :c_out].add(weights[i].astype(jnp.float32))

    # D[k] = x @ W_stack[k]   (small projection matmuls, reassociated form)
    d = _project(x_pad, w_stack, tm)           # (maxp+1, n_pad, c_out_p) f32

    if maxp == 0:                              # adj^0 = I: no propagation needed
        return jnp.maximum(d[0], 0.0)[:n, :c_out]

    # Chained propagation (Horner): r = D[maxp]; r = adj @ r + D[k], k = maxp-1..0
    r = d[maxp]
    for k in range(maxp - 1, -1, -1):
        r = _horner_step(adj_bf16, r, d[k], tm=tm, tk=tk, apply_relu=(k == 0))

    return r[:n, :c_out]


def init_graph_conv_params(key, n_in, n_out, powers=(1,)):
    """Analogue of GraphConv.reset_parameters (uniform ±1/sqrt(n_out))."""
    stdv = 1.0 / math.sqrt(n_out)
    k_w, k_b = jax.random.split(key)
    weights = jax.random.uniform(
        k_w, (len(powers), n_in, n_out), minval=-stdv, maxval=stdv,
        dtype=jnp.float32)
    # Bias exists on the module but is unused in forward(); kept for parity only.
    bias = jax.random.uniform(
        k_b, (n_out,), minval=-stdv, maxval=stdv, dtype=jnp.float32)
    return weights, bias


if __name__ == "__main__":
    key = jax.random.PRNGKey(0)
    k_x, k_adj, k_par = jax.random.split(key, 3)

    # Small graph, but big enough to exercise padding + a real (2 x 2) tile grid.
    N, C_IN, C_OUT = 200, 48, 96
    POWERS = (1, 2)

    x = jax.random.normal(k_x, (N, C_IN), dtype=jnp.float32)
    a = jax.random.uniform(k_adj, (N, N), dtype=jnp.float32)
    adj = (a + a.T) / (2.0 * N)                # symmetric, roughly normalized

    weights, _bias = init_graph_conv_params(k_par, C_IN, C_OUT, POWERS)

    out = graph_conv_forward(x, adj, weights, powers=POWERS)
    out = jax.block_until_ready(out)

    # Pure-JAX f32 reference (same math as the PyTorch forward).
    ref = jnp.zeros((N, C_OUT), jnp.float32)
    for i, p in enumerate(POWERS):
        ref = ref + jnp.linalg.matrix_power(adj, p) @ x @ weights[i]
    ref = jnp.maximum(ref, 0.0)

    # bf16 MXU operands => bf16-level tolerance vs. the f32 reference.
    assert out.shape == (N, C_OUT)
    assert bool(jnp.allclose(out, ref, atol=5e-3, rtol=5e-2)), \
        float(jnp.max(jnp.abs(out - ref)))

    print("KERNEL_OK")
</pallas_src>

<mosaic_0001>
module attributes {stable_mosaic.version = 11 : i64} {
  func.func @_project_kernel(%arg0: i32, %arg1: i32, %arg2: memref<128x48xf32, #tpu.memory_space<vmem>>, %arg3: memref<1x48x128xf32, #tpu.memory_space<vmem>>, %arg4: memref<1x128x128xf32, #tpu.memory_space<vmem>>) attributes {dimension_semantics = [#tpu.dimension_semantics<arbitrary>, #tpu.dimension_semantics<parallel>], iteration_bounds = array<i64: 3, 2>, scalar_prefetch = 0 : i64, scratch_operands = 0 : i64, tpu.core_type = #tpu.core_type<tc>, window_params = [{transform_indices = @transform_0, window_bounds = array<i64: 128, 48>}, {transform_indices = @transform_1, window_bounds = array<i64: 1, 48, 128>}, {transform_indices = @transform_2, window_bounds = array<i64: 1, 128, 128>}]} {
    %c0 = arith.constant 0 : index
    %c0_0 = arith.constant 0 : index
    %0 = vector.load %arg2[%c0, %c0_0] : memref<128x48xf32, #tpu.memory_space<vmem>>, vector<128x48xf32>
    %1 = arith.truncf %0 : vector<128x48xf32> to vector<128x48xbf16>
    %c0_1 = arith.constant 0 : index
    %c0_2 = arith.constant 0 : index
    %c0_3 = arith.constant 0 : index
    %2 = vector.load %arg3[%c0_1, %c0_2, %c0_3] : memref<1x48x128xf32, #tpu.memory_space<vmem>>, vector<1x48x128xf32>
    %3 = vector.shape_cast %2 : vector<1x48x128xf32> to vector<48x128xf32>
    %4 = arith.truncf %3 : vector<48x128xf32> to vector<48x128xbf16>
    %cst = arith.constant dense<0.000000e+00> : vector<128x128xf32>
    %5 = tpu.matmul %1, %4, %cst {dimension_numbers = #tpu.dot_dimension_numbers<[1], [0], [0], [1], [0, 0, 1, 1], [], []>} : vector<128x48xbf16>, vector<48x128xbf16>, vector<128x128xf32> -> vector<128x128xf32>
    %c0_4 = arith.constant 0 : index
    %c0_5 = arith.constant 0 : index
    %c0_6 = arith.constant 0 : index
    %6 = vector.load %arg4[%c0_4, %c0_5, %c0_6] : memref<1x128x128xf32, #tpu.memory_space<vmem>>, vector<1x128x128xf32>
    %7 = vector.shape_cast %6 : vector<1x128x128xf32> to vector<128x128xf32>
    %8 = vector.shape_cast %5 : vector<128x128xf32> to vector<1x128x128xf32>
    tpu.vector_store %arg4[%c0_4, %c0_5, %c0_6], %8 {strides = array<i32>} : memref<1x128x128xf32, #tpu.memory_space<vmem>>, vector<1x128x128xf32>,
    return
  }
  func.func @transform_0(%arg0: i32, %arg1: i32) -> (i32, i32) {
    %c0_i32 = arith.constant 0 : i32
    %c0_i32_0 = arith.constant 0 : i32
    return %arg1, %c0_i32 : i32, i32
  }
  func.func @transform_1(%arg0: i32, %arg1: i32) -> (i32, i32, i32) {
    %c0_i32 = arith.constant 0 : i32
    %c0_i32_0 = arith.constant 0 : i32
    %c0_i32_1 = arith.constant 0 : i32
    return %arg0, %c0_i32, %c0_i32_0 : i32, i32, i32
  }
  func.func @transform_2(%arg0: i32, %arg1: i32) -> (i32, i32, i32) {
    %c0_i32 = arith.constant 0 : i32
    %c0_i32_0 = arith.constant 0 : i32
    return %arg0, %arg1, %c0_i32 : i32, i32, i32
  }
}

module attributes {stable_mosaic.version = 11 : i64} {
  func.func @_horner_step_kernel(%arg0: i32, %arg1: i32, %arg2: memref<128x128xbf16, #tpu.memory_space<vmem>>, %arg3: memref<128x128xf32, #tpu.memory_space<vmem>>, %arg4: memref<128x128xf32, #tpu.memory_space<vmem>>, %arg5: memref<128x128xf32, #tpu.memory_space<vmem>>, %arg6: memref<128x128xf32, #tpu.memory_space<vmem>>) attributes {dimension_semantics = [#tpu.dimension_semantics<parallel>, #tpu.dimension_semantics<arbitrary>], iteration_bounds = array<i64: 2, 2>, scalar_prefetch = 0 : i64, scratch_operands = 1 : i64, tpu.core_type = #tpu.core_type<tc>, window_params = [{transform_indices = @transform_0, window_bounds = array<i64: 128, 128>}, {transform_indices = @transform_1, window_bounds = array<i64: 128, 128>}, {transform_indices = @transform_2, window_bounds = array<i64: 128, 128>}, {transform_indices = @transform_3, window_bounds = array<i64: 128, 128>}]} {
    %c0_i32 = arith.constant 0 : i32
    %0 = arith.cmpi eq, %arg1, %c0_i32 : i32
    %1 = arith.extui %0 : i1 to i32
    %c0_i32_0 = arith.constant 0 : i32
    %2 = arith.cmpi ne, %1, %c0_i32_0 : i32
    scf.if %2 {
      %cst_9 = arith.constant 0.000000e+00 : f32
      %13 = vector.broadcast %cst_9 : f32 to vector<128x128xf32>
      %c0_10 = arith.constant 0 : index
      %c0_11 = arith.constant 0 : index
      %14 = vector.load %arg6[%c0_10, %c0_11] : memref<128x128xf32, #tpu.memory_space<vmem>>, vector<128x128xf32>
      tpu.vector_store %arg6[%c0_10, %c0_11], %13 {strides = array<i32>} : memref<128x128xf32, #tpu.memory_space<vmem>>, vector<128x128xf32>,
    } else {
    }
    %c0 = arith.constant 0 : index
    %c0_1 = arith.constant 0 : index
    %3 = vector.load %arg6[%c0, %c0_1] : memref<128x128xf32, #tpu.memory_space<vmem>>, vector<128x128xf32>
    %c0_2 = arith.constant 0 : index
    %c0_3 = arith.constant 0 : index
    %4 = vector.load %arg2[%c0_2, %c0_3] : memref<128x128xbf16, #tpu.memory_space<vmem>>, vector<128x128xbf16>
    %c0_4 = arith.constant 0 : index
    %c0_5 = arith.constant 0 : index
    %5 = vector.load %arg3[%c0_4, %c0_5] : memref<128x128xf32, #tpu.memory_space<vmem>>, vector<128x128xf32>
    %6 = arith.truncf %5 : vector<128x128xf32> to vector<128x128xbf16>
    %cst = arith.constant dense<0.000000e+00> : vector<128x128xf32>
    %7 = tpu.matmul %4, %6, %cst {dimension_numbers = #tpu.dot_dimension_numbers<[1], [0], [0], [1], [0, 0, 1, 1], [], []>} : vector<128x128xbf16>, vector<128x128xbf16>, vector<128x128xf32> -> vector<128x128xf32>
    %8 = arith.addf %3, %7 : vector<128x128xf32>
    %c0_6 = arith.constant 0 : index
    %c0_7 = arith.constant 0 : index
    %9 = vector.load %arg6[%c0_6, %c0_7] : memref<128x128xf32, #tpu.memory_space<vmem>>, vector<128x128xf32>
    tpu.vector_store %arg6[%c0_6, %c0_7], %8 {strides = array<i32>} : memref<128x128xf32, #tpu.memory_space<vmem>>, vector<128x128xf32>,
    %c1_i32 = arith.constant 1 : i32
    %10 = arith.cmpi eq, %arg1, %c1_i32 : i32
    %11 = arith.extui %10 : i1 to i32
    %c0_i32_8 = arith.constant 0 : i32
    %12 = arith.cmpi ne, %11, %c0_i32_8 : i32
    scf.if %12 {
      %c0_9 = arith.constant 0 : index
      %c0_10 = arith.constant 0 : index
      %13 = vector.load %arg6[%c0_9, %c0_10] : memref<128x128xf32, #tpu.memory_space<vmem>>, vector<128x128xf32>
      %c0_11 = arith.constant 0 : index
      %c0_12 = arith.constant 0 : index
      %14 = vector.load %arg4[%c0_11, %c0_12] : memref<128x128xf32, #tpu.memory_space<vmem>>, vector<128x128xf32>
      %15 = arith.addf %13, %14 : vector<128x128xf32>
      %c0_13 = arith.constant 0 : index
      %c0_14 = arith.constant 0 : index
      %16 = vector.load %arg5[%c0_13, %c0_14] : memref<128x128xf32, #tpu.memory_space<vmem>>, vector<128x128xf32>
      tpu.vector_store %arg5[%c0_13, %c0_14], %15 {strides = array<i32>} : memref<128x128xf32, #tpu.memory_space<vmem>>, vector<128x128xf32>,
    } else {
    }
    return
  }
  func.func @transform_0(%arg0: i32, %arg1: i32) -> (i32, i32) {
    %c0_i32 = arith.constant 0 : i32
    return %arg0, %arg1 : i32, i32
  }
  func.func @transform_1(%arg0: i32, %arg1: i32) -> (i32, i32) {
    %c0_i32 = arith.constant 0 : i32
    %c0_i32_0 = arith.constant 0 : i32
    return %arg1, %c0_i32 : i32, i32
  }
  func.func @transform_2(%arg0: i32, %arg1: i32) -> (i32, i32) {
    %c0_i32 = arith.constant 0 : i32
    %c0_i32_0 = arith.constant 0 : i32
    return %arg0, %c0_i32 : i32, i32
  }
  func.func @transform_3(%arg0: i32, %arg1: i32) -> (i32, i32) {
    %c0_i32 = arith.constant 0 : i32
    %c0_i32_0 = arith.constant 0 : i32
    return %arg0, %c0_i32 : i32, i32
  }
}

module attributes {stable_mosaic.version = 11 : i64} {
  func.func @_horner_step_kernel(%arg0: i32, %arg1: i32, %arg2: memref<128x128xbf16, #tpu.memory_space<vmem>>, %arg3: memref<128x128xf32, #tpu.memory_space<vmem>>, %arg4: memref<128x128xf32, #tpu.memory_space<vmem>>, %arg5: memref<128x128xf32, #tpu.memory_space<vmem>>, %arg6: memref<128x128xf32, #tpu.memory_space<vmem>>) attributes {dimension_semantics = [#tpu.dimension_semantics<parallel>, #tpu.dimension_semantics<arbitrary>], iteration_bounds = array<i64: 2, 2>, scalar_prefetch = 0 : i64, scratch_operands = 1 : i64, tpu.core_type = #tpu.core_type<tc>, window_params = [{transform_indices = @transform_0, window_bounds = array<i64: 128, 128>}, {transform_indices = @transform_1, window_bounds = array<i64: 128, 128>}, {transform_indices = @transform_2, window_bounds = array<i64: 128, 128>}, {transform_indices = @transform_3, window_bounds = array<i64: 128, 128>}]} {
    %c0_i32 = arith.constant 0 : i32
    %0 = arith.cmpi eq, %arg1, %c0_i32 : i32
    %1 = arith.extui %0 : i1 to i32
    %c0_i32_0 = arith.constant 0 : i32
    %2 = arith.cmpi ne, %1, %c0_i32_0 : i32
    scf.if %2 {
      %cst_9 = arith.constant 0.000000e+00 : f32
      %13 = vector.broadcast %cst_9 : f32 to vector<128x128xf32>
      %c0_10 = arith.constant 0 : index
      %c0_11 = arith.constant 0 : index
      %14 = vector.load %arg6[%c0_10, %c0_11] : memref<128x128xf32, #tpu.memory_space<vmem>>, vector<128x128xf32>
      tpu.vector_store %arg6[%c0_10, %c0_11], %13 {strides = array<i32>} : memref<128x128xf32, #tpu.memory_space<vmem>>, vector<128x128xf32>,
    } else {
    }
    %c0 = arith.constant 0 : index
    %c0_1 = arith.constant 0 : index
    %3 = vector.load %arg6[%c0, %c0_1] : memref<128x128xf32, #tpu.memory_space<vmem>>, vector<128x128xf32>
    %c0_2 = arith.constant 0 : index
    %c0_3 = arith.constant 0 : index
    %4 = vector.load %arg2[%c0_2, %c0_3] : memref<128x128xbf16, #tpu.memory_space<vmem>>, vector<128x128xbf16>
    %c0_4 = arith.constant 0 : index
    %c0_5 = arith.constant 0 : index
    %5 = vector.load %arg3[%c0_4, %c0_5] : memref<128x128xf32, #tpu.memory_space<vmem>>, vector<128x128xf32>
    %6 = arith.truncf %5 : vector<128x128xf32> to vector<128x128xbf16>
    %cst = arith.constant dense<0.000000e+00> : vector<128x128xf32>
    %7 = tpu.matmul %4, %6, %cst {dimension_numbers = #tpu.dot_dimension_numbers<[1], [0], [0], [1], [0, 0, 1, 1], [], []>} : vector<128x128xbf16>, vector<128x128xbf16>, vector<128x128xf32> -> vector<128x128xf32>
    %8 = arith.addf %3, %7 : vector<128x128xf32>
    %c0_6 = arith.constant 0 : index
    %c0_7 = arith.constant 0 : index
    %9 = vector.load %arg6[%c0_6, %c0_7] : memref<128x128xf32, #tpu.memory_space<vmem>>, vector<128x128xf32>
    tpu.vector_store %arg6[%c0_6, %c0_7], %8 {strides = array<i32>} : memref<128x128xf32, #tpu.memory_space<vmem>>, vector<128x128xf32>,
    %c1_i32 = arith.constant 1 : i32
    %10 = arith.cmpi eq, %arg1, %c1_i32 : i32
    %11 = arith.extui %10 : i1 to i32
    %c0_i32_8 = arith.constant 0 : i32
    %12 = arith.cmpi ne, %11, %c0_i32_8 : i32
    scf.if %12 {
      %c0_9 = arith.constant 0 : index
      %c0_10 = arith.constant 0 : index
      %13 = vector.load %arg6[%c0_9, %c0_10] : memref<128x128xf32, #tpu.memory_space<vmem>>, vector<128x128xf32>
      %c0_11 = arith.constant 0 : index
      %c0_12 = arith.constant 0 : index
      %14 = vector.load %arg4[%c0_11, %c0_12] : memref<128x128xf32, #tpu.memory_space<vmem>>, vector<128x128xf32>
      %15 = arith.addf %13, %14 : vector<128x128xf32>
      %cst_13 = arith.constant 0.000000e+00 : f32
      %16 = vector.broadcast %cst_13 : f32 to vector<128x128xf32>
      %17 = arith.maximumf %15, %16 : vector<128x128xf32>
      %c0_14 = arith.constant 0 : index
      %c0_15 = arith.constant 0 : index
      %18 = vector.load %arg5[%c0_14, %c0_15] : memref<128x128xf32, #tpu.memory_space<vmem>>, vector<128x128xf32>
      tpu.vector_store %arg5[%c0_14, %c0_15], %17 {strides = array<i32>} : memref<128x128xf32, #tpu.memory_space<vmem>>, vector<128x128xf32>,
    } else {
    }
    return
  }
  func.func @transform_0(%arg0: i32, %arg1: i32) -> (i32, i32) {
    %c0_i32 = arith.constant 0 : i32
    return %arg0, %arg1 : i32, i32
  }
  func.func @transform_1(%arg0: i32, %arg1: i32) -> (i32, i32) {
    %c0_i32 = arith.constant 0 : i32
    %c0_i32_0 = arith.constant 0 : i32
    return %arg1, %c0_i32 : i32, i32
  }
  func.func @transform_2(%arg0: i32, %arg1: i32) -> (i32, i32) {
    %c0_i32 = arith.constant 0 : i32
    %c0_i32_0 = arith.constant 0 : i32
    return %arg0, %c0_i32 : i32, i32
  }
  func.func @transform_3(%arg0: i32, %arg1: i32) -> (i32, i32) {
    %c0_i32 = arith.constant 0 : i32
    %c0_i32_0 = arith.constant 0 : i32
    return %arg0, %c0_i32 : i32, i32
  }
}

</mosaic_0001>

<bundles_post_ra>
// kernel: graph_conv_forward.3
= control target key start
LH: loop header
LB: loop body
LE: loop exit
PB: predicated region body
PF: predicated region fallthrough
CT: control target
= control target key end

     0   :  { %s613_s9 = smov 0   ;;  %s615_s10 = smov 0   ;;  %s714_s0 = inlined_call_operand.vmem [shape: f32[256,48], index: 0, kind: input, shape index: {}]   ;;  %s715_s1 = inlined_call_operand.vmem [shape: f32[3,48,128], index: 1, kind: input, shape index: {}]   ;;  %s716_s2 = inlined_call_operand.vmem [shape: f32[3,256,128], index: 2, kind: output, shape index: {}]  }
   0x1   :  { %s617_s11 = smov 0   ;;  %s619_s12 = smov 0  }
   0x2   :  { %s621_s13 = smov 0  }
   0x3 LB: > { %s21_s14 = sadd.s32 1, %s588_s11  ;;  %s24_s15 = sadd.s32 1, %s592_s12  ;;  %s596_s13 = sphi %s621_s13, %s12_s13   ;;  %s592_s12 = sphi %s619_s12, %s720_s12   ;;  %s588_s11 = sphi %s617_s11, %s719_s11   ;;  %s584_s10 = sphi %s615_s10, %s718_s10   ;;  %s580_s9 = sphi %s613_s9, %s717_s9  }
   0x4   : > { %p22_p0 = scmp.ge.s32.totalorder %s21_s14, 2  ;;  %p461_p1 = scmp.ge.s32.totalorder %s596_s13, 1 }
   0x5   : > { %p137_p2 = scmp.lt.s32.totalorder %s596_s13, 7 }
   0x6   : > { %s722_s14 = smov (%p22_p0, %s21_s14), 0  ;;  %s724_s15 = smov (!%p22_p0, %s24_s15), %s592_s12 }
   0x7   : > { %p138_p3 = pnand %p461_p1, %p137_p2  ;;  %p26_p4 = scmp.ge.s32.totalorder %s724_s15, 3 }
   0x8   : > { %s462_s16 = sshll.u32 (!%p138_p3), %s580_s9, 4  ;;  %p174_p5 = scmp.lt.s32.totalorder (!%p138_p3), %s584_s10, 2  ;;  %vm223_vm0 = vcmask (!%p138_p3), 392192  }
   0x9   : > { %s726_s15 = smov (%p26_p4, %s724_s15), 0  ;;  %141 = sbr.rel (%p138_p3) target bundleno = 259 (0x103), region = 28 }
   0xa   : > { %p169_p6 = scmp.lt.s32.totalorder (!%p138_p3), %s462_s16, 31 }
  0x10   : > { %s728_s10 = smov (!%p174_p5, %s584_s10), 2  ;;  %s730_s16 = smov (!%p169_p6, %s462_s16), 31 }
  0x11   : > { %s517_s17 = smul.u32 48, %s728_s10  ;;  %s466_s18 = sshll.u32 %s728_s10, 5 }
  0x12   : > { %s463_s19 = sshll.u32 %s730_s16, 3  ;;  %s643_s20 = sadd.s32 %s466_s18, %s730_s16 }
  0x13   : > { %s648_s23 = scalar_lea.vmem %s714_s0, %s463_s19  ;;  %s178_s26 = scalar_lea.vmem %s715_s1, %s517_s17 }
  0x14   : > { %v214_v0 = vld [vmem:[%s178_s26] sm:$0xff]  ;;  %v215_v1 = vld [vmem:[%s178_s26 + $0x8] sm:$0xff]  ;;  %v216_v2 = vld [vmem:[%s178_s26 + $0x10] sm:$0xff]  ;;  %s467_s27 = sshll.u32 %s643_s20, 3 }
  0x15   : > { %v220_v3 = vpack.c.bf16 %v215_v1, %v214_v0  ;;  %v217_v4 = vld [vmem:[%s178_s26 + $0x18] sm:$0xff]  ;;  %v218_v5 = vld [vmem:[%s178_s26 + $0x20] sm:$0xff]  ;;  %v219_v6 = vld [vmem:[%s178_s26 + $0x28] sm:$0xff]  ;;  %s681_s30 = scalar_lea.vmem %s716_s2, %s467_s27 }
  0x16   : > { %v221_v7 = vpack.c.bf16 %v217_v4, %v216_v2  ;;  %v190_v8 = vld [vmem:[%s648_s23] sm:$0xff]  ;;  %v191_v9 = vld [vmem:[%s648_s23 + $0x8] sm:$0xff]  ;;  %v222_v14 = vpack.c.bf16 %v219_v6, %v218_v5  ;;  %v192_v15 = vld [vmem:[%s648_s23 + $0x10] sm:$0xff] }
  0x17   : > { %v198_v10 = vld [vmem:[%s648_s23 + $0x40] sm:$0xff]  ;;  %489 = vmatprep.subr.bf16.mxu0 %v220_v3  ;;  %511 = vmatprep.subr.bf16.mxu1 %v220_v3  ;;  %v206_v11 = vpack.c.bf16 %v191_v9, %v190_v8  ;;  %v199_v12 = vld [vmem:[%s648_s23 + $0x48] sm:$0xff]  ;;  %v193_v16 = vld [vmem:[%s648_s23 + $0x18] sm:$0xff] }
  0x18   : > { %490 = vmatpush3.bf16.msra.mxu0 %v220_v3  ;;  %514 = vmatpush3.bf16.msra.mxu1 %v220_v3  ;;  %v210_v13 = vpack.c.bf16 %v199_v12, %v198_v10  ;;  %v200_v17 = vld [vmem:[%s648_s23 + $0x50] sm:$0xff]  ;;  %v201_v18 = vld [vmem:[%s648_s23 + $0x58] sm:$0xff]  ;;  %v194_v19 = vld [vmem:[%s648_s23 + $0x20] sm:$0xff]  ;;  %v207_v23 = vpack.c.bf16 %v193_v16, %v192_v15 }
  0x19   : > { %491 = vmatprep.subr.bf16.mxu0 %v221_v7  ;;  %512 = vmatprep.subr.bf16.mxu1 %v221_v7  ;;  %v195_v20 = vld [vmem:[%s648_s23 + $0x28] sm:$0xff]  ;;  %v202_v21 = vld [vmem:[%s648_s23 + $0x60] sm:$0xff]  ;;  %v211_v24 = vpack.c.bf16 %v201_v18, %v200_v17  ;;  %v196_v27 = vld [vmem:[%s648_s23 + $0x30] sm:$0xff] }
  0x1a   : > { %495 = vmatprep.mubr.msk.bf16.mxu0 %vm223_vm0, %v206_v11  ;;  %503 = vmatprep.mubr.msk.bf16.mxu1 %vm223_vm0, %v210_v13  ;;  %v203_v22 = vld [vmem:[%s648_s23 + $0x68] sm:$0xff]  ;;  %v208_v25 = vpack.c.bf16 %v195_v20, %v194_v19  ;;  %v197_v28 = vld [vmem:[%s648_s23 + $0x38] sm:$0xff]  ;;  %v204_v29 = vld [vmem:[%s648_s23 + $0x70] sm:$0xff] }
  0x1b   : > { %v212_v26 = vpack.c.bf16 %v203_v22, %v202_v21  ;;  %v205_v30 = vld [vmem:[%s648_s23 + $0x78] sm:$0xff]  ;;  %v209_v31 = vpack.c.bf16 %v197_v28, %v196_v27 }
  0x1c   : > { %492 = vmatpush3.bf16.msra.mxu0 %v221_v7  ;;  %515 = vmatpush3.bf16.msra.mxu1 %v221_v7  ;;  %v213_v32 = vpack.c.bf16 %v205_v30, %v204_v29 }
  0x1d   : > { %493 = vmatprep.subr.bf16.mxu0 %v222_v14  ;;  %513 = vmatprep.subr.bf16.mxu1 %v222_v14 }
  0x20   : > { %494 = vmatpush3.bf16.msra.mxu0 %v222_v14  ;;  %516 = vmatpush3.bf16.msra.mxu1 %v222_v14 }
  0x23   : > { %496 = vmatmul.mubr.msk.bf16.vlgmr.msra.gmra.mrb[0].mxu0 %vm223_vm0, %v207_v23  ;;  %504 = vmatmul.mubr.msk.bf16.vlgmr.msra.gmra.mrb[0].mxu1 %vm223_vm0, %v211_v24 }
  0x24   : > { %499 = vmatprep.mubr.msk.bf16.mxu0 %vm223_vm0, %v208_v25  ;;  %507 = vmatprep.mubr.msk.bf16.mxu1 %vm223_vm0, %v212_v26 }
  0x2b   : > { %500 = vmatmul.mubr.msk.bf16.gmra.mrb[4].mxu0 %vm223_vm0, %v209_v31  ;;  %508 = vmatmul.mubr.msk.bf16.gmra.mrb[4].mxu1 %vm223_vm0, %v213_v32 }
  0xf6   : > { %v497_v33 = vpop.f32.mrb[0].mxu0  ;;  %v505_v34 = vpop.f32.mrb[0].mxu1 }
  0xf7   : > { %347 = vst [vmem:[%s681_s30 + $0x10] sm:$0xff] %v497_v33  ;;  %355 = vst [vmem:[%s681_s30 + $0x50] sm:$0xff] %v505_v34  ;;  %v282_v35 = vpop.f32.mrb[1].mxu0  ;;  %v314_v36 = vpop.f32.mrb[1].mxu1 }
  0xf8   : > { %345 = vst [vmem:[%s681_s30] sm:$0xff] %v282_v35  ;;  %353 = vst [vmem:[%s681_s30 + $0x40] sm:$0xff] %v314_v36  ;;  %v498_v37 = vpop.f32.mrb[2].mxu0  ;;  %v506_v38 = vpop.f32.mrb[2].mxu1 }
  0xf9   : > { %348 = vst [vmem:[%s681_s30 + $0x18] sm:$0xff] %v498_v37  ;;  %356 = vst [vmem:[%s681_s30 + $0x58] sm:$0xff] %v506_v38  ;;  %v285_v39 = vpop.f32.mrb[3].mxu0  ;;  %v317_v40 = vpop.f32.mrb[3].mxu1 }
  0xfa   : > { %346 = vst [vmem:[%s681_s30 + $0x8] sm:$0xff] %v285_v39  ;;  %354 = vst [vmem:[%s681_s30 + $0x48] sm:$0xff] %v317_v40 }
  0xfe   : > { %v501_v41 = vpop.f32.mrb[4].mxu0  ;;  %v509_v42 = vpop.f32.mrb[4].mxu1 }
  0xff   : > { %351 = vst [vmem:[%s681_s30 + $0x30] sm:$0xff] %v501_v41  ;;  %359 = vst [vmem:[%s681_s30 + $0x70] sm:$0xff] %v509_v42  ;;  %v298_v43 = vpop.f32.mrb[5].mxu0  ;;  %v330_v44 = vpop.f32.mrb[5].mxu1 }
 0x100   : > { %349 = vst [vmem:[%s681_s30 + $0x20] sm:$0xff] %v298_v43  ;;  %357 = vst [vmem:[%s681_s30 + $0x60] sm:$0xff] %v330_v44  ;;  %v502_v45 = vpop.f32.mrb[6].mxu0  ;;  %v510_v46 = vpop.f32.mrb[6].mxu1 }
 0x101   : > { %352 = vst [vmem:[%s681_s30 + $0x38] sm:$0xff] %v502_v45  ;;  %360 = vst [vmem:[%s681_s30 + $0x78] sm:$0xff] %v510_v46  ;;  %v301_v47 = vpop.f32.mrb[7].mxu0  ;;  %v333_v48 = vpop.f32.mrb[7].mxu1 }
 0x102   : > { %350 = vst [vmem:[%s681_s30 + $0x28] sm:$0xff] %v301_v47  ;;  %358 = vst [vmem:[%s681_s30 + $0x68] sm:$0xff] %v333_v48 }
 0x103 PF: > { %s12_s13 = sadd.s32 1, %s596_s13   ;;  %s717_s9 = smov %s588_s11 }
 0x104   : > { %p9_p7 = scmp.ge.s32.totalorder %s12_s13, 8   ;;  %s718_s10 = smov %s592_s12 }
 0x105   : > { %s719_s11 = smov %s722_s14  ;;  %s720_s12 = smov %s726_s15 }
 0x106   :  { %11 = sbr.rel (!%p9_p7) target bundleno = 3 (0x3), region = 61 }

// kernel: graph_conv_forward.4
= control target key start
LH: loop header
LB: loop body
LE: loop exit
PB: predicated region body
PF: predicated region fallthrough
CT: control target
= control target key end

     0   :  { %s992_s12 = smov 0   ;;  %s994_s13 = smov 0   ;;  %s1171_s0 = inlined_call_operand.vmem [shape: bf16[256,256], index: 0, kind: input, shape index: {}]   ;;  %s1172_s1 = inlined_call_operand.vmem [shape: f32[256,128], index: 1, kind: input, shape index: {}]   ;;  %s1173_s2 = inlined_call_operand.vmem [shape: f32[256,128], index: 2, kind: input, shape index: {}]   ;;  %s1174_s3 = inlined_call_operand.vmem [shape: f32[256,128], index: 3, kind: output, shape index: {}]  }
   0x1   :  { %s996_s14 = smov 0   ;;  %s998_s15 = smov 0  }
   0x2   :  { %s1000_s16 = smov 0   ;;  %s1002_s17 = smov 0  }
   0x3   :  { %s1004_s18 = smov 0  }
   0x4 LB: > { %s22_s19 = sadd.s32 1, %s961_s16  ;;  %s25_s20 = sadd.s32 1, %s965_s17  ;;  %s969_s18 = sphi %s1004_s18, %s13_s18   ;;  %s965_s17 = sphi %s1002_s17, %s1180_s17   ;;  %s961_s16 = sphi %s1000_s16, %s1179_s16   ;;  %s957_s15 = sphi %s998_s15, %s1178_s15   ;;  %s953_s14 = sphi %s996_s14, %s1177_s14   ;;  %s949_s13 = sphi %s994_s13, %s1176_s13   ;;  %s945_s12 = sphi %s992_s12, %s1175_s12  }
   0x5   : > { %p23_p0 = scmp.ge.s32.totalorder %s22_s19, 2  ;;  %p41_p1 = scmp.ne.s32.totalorder %s949_s13, %s945_s12 }
   0x6   : > { %p42_p2 = scmp.eq.s32.totalorder %s969_s18, 0  ;;  %s34_s24 = sadd.s32 1, %s949_s13 }
   0x7   : > { %s1182_s19 = smov (%p23_p0, %s22_s19), 0  ;;  %s1184_s20 = smov (!%p23_p0, %s25_s20), %s965_s17 }
   0x8   : > { %p43_p3 = por %p42_p2, %p41_p1  ;;  %p27_p4 = scmp.ge.s32.totalorder %s1184_s20, 2 }
   0x9   : > { %s30_s21 = ssub.s32 %s961_s16, %s1182_s19  ;;  %p760_p6 = scmp.ge.s32.totalorder %s969_s18, 4 }
   0xa   : > { %s1186_s20 = smov (%p27_p4, %s1184_s20), 0 }
   0xb   : > { %s29_s22 = ssub.s32 %s965_s17, %s1186_s20  ;;  %145 = sbr.rel (%p760_p6) target bundleno = 34 (0x22), region = 16 }
   0xc   : > { %s31_s23 = sor.u32 %s30_s21, %s29_s22 }
   0xd   : > { %p32_p5 = scmp.eq.s32.totalorder %s31_s23, 0 }
   0xf   : > { %s1043_s25 = scalar_select %p32_p5, %s949_s13, %s34_s24  }
  0x12   : > { %148 = sbr.rel (!%p43_p3) target bundleno = 34 (0x22), region = 20  ;;  %s150_s26 = sand.u32 (%p43_p3), 1, %s949_s13  }
  0x13   : > { %s785_s27 = sshll.u32 (%p43_p3), %s965_s17, 5  ;;  %s761_s28 = sshll.u32 (%p43_p3), %s150_s26, 6 }
  0x14   : > { %s155_s29 = sadd.s32 (%p43_p3), %s961_s16, %s785_s27  ;;  %s152_s7 = scalar_lea.vmem (%p43_p3), [#allocation3], %s761_s28 }
  0x15   : > { %s764_s30 = sshll.u32 (%p43_p3), %s155_s29, 2 }
  0x16   : > { %s1052_s6 = scalar_lea.vmem (%p43_p3), %s1171_s0, %s764_s30 }
  0x17   : > { %v173_v0 = vld [vmem:[%s1052_s6] sm:$0xf] (%p43_p3)  ;;  %v175_v1 = vld [vmem:[%s1052_s6 + $0x8] sm:$0xf] (%p43_p3)  ;;  %v177_v2 = vld [vmem:[%s1052_s6 + $0x10] sm:$0xf] (%p43_p3) }
  0x18   : > { %174 = vst [vmem:[%s152_s7] sm:$0xf] (%p43_p3), %v173_v0  ;;  %176 = vst [vmem:[%s152_s7 + $0x4] sm:$0xf] (%p43_p3), %v175_v1  ;;  %v179_v3 = vld [vmem:[%s1052_s6 + $0x18] sm:$0xf] (%p43_p3) }
  0x19   : > { %178 = vst [vmem:[%s152_s7 + $0x8] sm:$0xf] %v177_v2  ;;  %v181_v4 = vld [vmem:[%s1052_s6 + $0x20] sm:$0xf]  ;;  %v183_v5 = vld [vmem:[%s1052_s6 + $0x28] sm:$0xf] }
  0x1a   : > { %180 = vst [vmem:[%s152_s7 + $0xc] sm:$0xf] %v179_v3  ;;  %182 = vst [vmem:[%s152_s7 + $0x10] sm:$0xf] %v181_v4  ;;  %v185_v6 = vld [vmem:[%s1052_s6 + $0x30] sm:$0xf] }
  0x1b   : > { %184 = vst [vmem:[%s152_s7 + $0x14] sm:$0xf] %v183_v5  ;;  %v187_v7 = vld [vmem:[%s1052_s6 + $0x38] sm:$0xf]  ;;  %v189_v8 = vld [vmem:[%s1052_s6 + $0x40] sm:$0xf] }
  0x1c   : > { %186 = vst [vmem:[%s152_s7 + $0x18] sm:$0xf] %v185_v6  ;;  %188 = vst [vmem:[%s152_s7 + $0x1c] sm:$0xf] %v187_v7  ;;  %v191_v9 = vld [vmem:[%s1052_s6 + $0x48] sm:$0xf] }
  0x1d   : > { %190 = vst [vmem:[%s152_s7 + $0x20] sm:$0xf] %v189_v8  ;;  %v193_v10 = vld [vmem:[%s1052_s6 + $0x50] sm:$0xf]  ;;  %v195_v11 = vld [vmem:[%s1052_s6 + $0x58] sm:$0xf] }
  0x1e   : > { %192 = vst [vmem:[%s152_s7 + $0x24] sm:$0xf] %v191_v9  ;;  %194 = vst [vmem:[%s152_s7 + $0x28] sm:$0xf] %v193_v10  ;;  %v197_v12 = vld [vmem:[%s1052_s6 + $0x60] sm:$0xf] }
  0x1f   : > { %196 = vst [vmem:[%s152_s7 + $0x2c] sm:$0xf] %v195_v11  ;;  %v199_v13 = vld [vmem:[%s1052_s6 + $0x68] sm:$0xf]  ;;  %v201_v14 = vld [vmem:[%s1052_s6 + $0x70] sm:$0xf] }
  0x20   : > { %198 = vst [vmem:[%s152_s7 + $0x30] sm:$0xf] %v197_v12  ;;  %200 = vst [vmem:[%s152_s7 + $0x34] sm:$0xf] %v199_v13  ;;  %v203_v15 = vld [vmem:[%s1052_s6 + $0x78] sm:$0xf] }
  0x21   : > { %202 = vst [vmem:[%s152_s7 + $0x38] sm:$0xf] %v201_v14  ;;  %204 = vst [vmem:[%s152_s7 + $0x3c] sm:$0xf] %v203_v15 }
  0x22 PF: > { %p765_p7 = scmp.ge.s32.totalorder %s969_s18, 1  ;;  %p276_p8 = scmp.lt.s32.totalorder %s969_s18, 5 }
  0x24   : > { %p277_p9 = pnand %p765_p7, %p276_p8 }
  0x25   : > { %s283_s8 = sand.u32 (!%p277_p9), 1, %s945_s12   ;;  %s767_s9 = sshll.u32 (!%p277_p9), %s953_s14, 4 }
  0x26   : > { %280 = sbr.rel (%p277_p9) target bundleno = 327 (0x147), region = 69  ;;  %s766_s10 = sshll.u32 (!%p277_p9), %s283_s8, 6 }
  0x27   : > { %p318_p10 = scmp.lt.s32.totalorder (!%p277_p9), %s767_s9, 31  ;;  %s769_s11 = sshll.u32 (!%p277_p9), %s957_s15, 4 }
  0x28   : > { %p324_p11 = scmp.lt.s32.totalorder (!%p277_p9), %s769_s11, 31  ;;  %s1090_s15 = scalar_lea.vmem (!%p277_p9), [#allocation3], %s766_s10 }
  0x29   : > { %p773_p12 = scmp.ne.s32.totalorder (!%p277_p9), %s953_s14, 0 }
  0x2d   : > { %s1188_s9 = smov (!%p318_p10, %s767_s9), 31  ;;  %s1190_s11 = smov (!%p324_p11, %s769_s11), 31 }
  0x2e   : > { %s768_s21 = sshll.u32 %s1188_s9, 3  ;;  %s770_s26 = sshll.u32 %s1190_s11, 3  ;;  %v971_v16 = vmov (!%p773_p12), 0.0  }
  0x2f   : > { %s1078_s24 = scalar_lea.vmem %s1172_s1, %s768_s21  ;;  %s1083_s29 = scalar_lea.vmem %s1173_s2, %s770_s26  ;;  %340 = vst [vmem:[#allocation2] sm:$0xff] (!%p773_p12), %v971_v16  ;;  %341 = vst [vmem:[#allocation2 + $0x8] sm:$0xff] (!%p773_p12), %v971_v16 }
  0x30   : > { %s1088_s4 = scalar_lea.vmem %s1174_s3, %s770_s26  ;;  %339 = sbr.rel (%p773_p12) target bundleno = 55 (0x37), region = 77  ;;  %342 = vst [vmem:[#allocation2 + $0x10] sm:$0xff] (!%p773_p12), %v971_v16  ;;  %343 = vst [vmem:[#allocation2 + $0x18] sm:$0xff] (!%p773_p12), %v971_v16 }
  0x31   : > { %344 = vst [vmem:[#allocation2 + $0x20] sm:$0xff] (!%p773_p12), %v971_v16  ;;  %345 = vst [vmem:[#allocation2 + $0x28] sm:$0xff] (!%p773_p12), %v971_v16 }
  0x32   : > { %346 = vst [vmem:[#allocation2 + $0x30] sm:$0xff] (!%p773_p12), %v971_v16  ;;  %347 = vst [vmem:[#allocation2 + $0x38] sm:$0xff] (!%p773_p12), %v971_v16 }
  0x33   : > { %348 = vst [vmem:[#allocation2 + $0x40] sm:$0xff] (!%p773_p12), %v971_v16  ;;  %349 = vst [vmem:[#allocation2 + $0x48] sm:$0xff] (!%p773_p12), %v971_v16 }
  0x34   : > { %350 = vst [vmem:[#allocation2 + $0x50] sm:$0xff] (!%p773_p12), %v971_v16  ;;  %351 = vst [vmem:[#allocation2 + $0x58] sm:$0xff] (!%p773_p12), %v971_v16 }
  0x35   : > { %352 = vst [vmem:[#allocation2 + $0x60] sm:$0xff] (!%p773_p12), %v971_v16  ;;  %353 = vst [vmem:[#allocation2 + $0x68] sm:$0xff] (!%p773_p12), %v971_v16 }
  0x36   : > { %354 = vst [vmem:[#allocation2 + $0x70] sm:$0xff] (!%p773_p12), %v971_v16  ;;  %355 = vst [vmem:[#allocation2 + $0x78] sm:$0xff] (!%p773_p12), %v971_v16 }
  0x37 PF: > { %v388_v17 = vld [vmem:[%s1078_s24] sm:$0xff]  ;;  %v389_v18 = vld [vmem:[%s1078_s24 + $0x8] sm:$0xff]  ;;  %v390_v19 = vld [vmem:[%s1078_s24 + $0x10] sm:$0xff]  ;;  %p782_p13 = scmp.ne.s32.totalorder %s953_s14, 1 }
  0x38   : > { %v404_v20 = vpack.c.bf16 %v389_v18, %v388_v17  ;;  %v391_v21 = vld [vmem:[%s1078_s24 + $0x18] sm:$0xff]  ;;  %v392_v23 = vld [vmem:[%s1078_s24 + $0x20] sm:$0xff]  ;;  %v393_v24 = vld [vmem:[%s1078_s24 + $0x28] sm:$0xff] }
  0x39   : > { %v405_v22 = vpack.c.bf16 %v391_v21, %v390_v19  ;;  %v394_v25 = vld [vmem:[%s1078_s24 + $0x30] sm:$0xff]  ;;  %v406_v26 = vpack.c.bf16 %v393_v24, %v392_v23  ;;  %v395_v27 = vld [vmem:[%s1078_s24 + $0x38] sm:$0xff]  ;;  %v907_v28 = vld [vmem:[%s1090_s15] sm:$0xff]  }
  0x3a   : > { %802 = vmatprep.subr.bf16.mxu0 %v404_v20  ;;  %834 = vmatprep.subr.bf16.mxu1 %v404_v20  ;;  %v908_v29 = vld [vmem:[%s1090_s15 + $0x20] sm:$0xff]   ;;  %v407_v30 = vpack.c.bf16 %v395_v27, %v394_v25  ;;  %v397_v32 = vld [vmem:[%s1078_s24 + $0x48] sm:$0xff]  ;;  %v398_v34 = vld [vmem:[%s1078_s24 + $0x50] sm:$0xff] }
  0x3b   : > { %803 = vmatpush3.bf16.msra.mxu0 %v404_v20  ;;  %842 = vmatpush3.bf16.msra.mxu1 %v404_v20  ;;  %v396_v31 = vld [vmem:[%s1078_s24 + $0x40] sm:$0xff]  ;;  %v399_v35 = vld [vmem:[%s1078_s24 + $0x58] sm:$0xff]  ;;  %v401_v38 = vld [vmem:[%s1078_s24 + $0x68] sm:$0xff] }
  0x3c   : > { %804 = vmatprep.subr.bf16.mxu0 %v405_v22  ;;  %835 = vmatprep.subr.bf16.mxu1 %v405_v22  ;;  %v408_v33 = vpack.c.bf16 %v397_v32, %v396_v31  ;;  %v409_v36 = vpack.c.bf16 %v399_v35, %v398_v34  ;;  %v400_v37 = vld [vmem:[%s1078_s24 + $0x60] sm:$0xff]  ;;  %v402_v40 = vld [vmem:[%s1078_s24 + $0x70] sm:$0xff]  ;;  %v403_v41 = vld [vmem:[%s1078_s24 + $0x78] sm:$0xff] }
  0x3d   : > { %818 = vmatprep.mubr.bf16.mxu0 %v907_v28  ;;  %826 = vmatprep.mubr.bf16.mxu1 %v908_v29  ;;  %v410_v39 = vpack.c.bf16 %v401_v38, %v400_v37  ;;  %v411_v42 = vpack.c.bf16 %v403_v41, %v402_v40  ;;  %v909_v43 = vld [vmem:[%s1090_s15 + $0x8] sm:$0xff]   ;;  %v911_v45 = vld [vmem:[%s1090_s15 + $0x10] sm:$0xff]   ;;  %v913_v47 = vld [vmem:[%s1090_s15 + $0x18] sm:$0xff]  }
  0x3e   : > { %v910_v44 = vld [vmem:[%s1090_s15 + $0x28] sm:$0xff]   ;;  %v912_v46 = vld [vmem:[%s1090_s15 + $0x30] sm:$0xff]   ;;  %v914_v48 = vld [vmem:[%s1090_s15 + $0x38] sm:$0xff]  }
  0x3f   : > { %805 = vmatpush3.bf16.msra.mxu0 %v405_v22  ;;  %843 = vmatpush3.bf16.msra.mxu1 %v405_v22  ;;  %v358_v49 = vld [vmem:[#allocation2 + $0x10] sm:$0xff]  ;;  %v356_v51 = vld [vmem:[#allocation2] sm:$0xff]  ;;  %v359_v55 = vld [vmem:[#allocation2 + $0x18] sm:$0xff] }
  0x40   : > { %806 = vmatprep.subr.bf16.mxu0 %v406_v26  ;;  %836 = vmatprep.subr.bf16.mxu1 %v406_v26  ;;  %v366_v50 = vld [vmem:[#allocation2 + $0x50] sm:$0xff]  ;;  %v364_v52 = vld [vmem:[#allocation2 + $0x40] sm:$0xff]  ;;  %v367_v56 = vld [vmem:[#allocation2 + $0x58] sm:$0xff] }
  0x41   : > { %v357_v61 = vld [vmem:[#allocation2 + $0x8] sm:$0xff]  ;;  %v362_v9 = vld [vmem:[#allocation2 + $0x30] sm:$0xff]  ;;  %v360_v11 = vld [vmem:[#allocation2 + $0x20] sm:$0xff] }
  0x42   : > { %v365_v62 = vld [vmem:[#allocation2 + $0x48] sm:$0xff]  ;;  %v370_v10 = vld [vmem:[#allocation2 + $0x70] sm:$0xff]  ;;  %v368_v12 = vld [vmem:[#allocation2 + $0x60] sm:$0xff] }
  0x43   : > { %807 = vmatpush3.bf16.msra.mxu0 %v406_v26  ;;  %844 = vmatpush3.bf16.msra.mxu1 %v406_v26  ;;  %v363_v15 = vld [vmem:[#allocation2 + $0x38] sm:$0xff]  ;;  %v361_v21 = vld [vmem:[#allocation2 + $0x28] sm:$0xff]  ;;  %v609_v34 = vld [vmem:[%s1083_s29] sm:$0xff] (!%p782_p13) }
  0x44   : > { %808 = vmatprep.subr.bf16.mxu0 %v407_v30  ;;  %837 = vmatprep.subr.bf16.mxu1 %v407_v30  ;;  %v371_v16 = vld [vmem:[#allocation2 + $0x78] sm:$0xff]  ;;  %v369_v22 = vld [vmem:[#allocation2 + $0x68] sm:$0xff] }
  0x45   : > { %v610_v37 = vld [vmem:[%s1083_s29 + $0x8] sm:$0xff] (!%p782_p13) }
  0x47   : > { %809 = vmatpush3.bf16.msra.mxu0 %v407_v30  ;;  %845 = vmatpush3.bf16.msra.mxu1 %v407_v30 }
  0x48   : > { %810 = vmatprep.subr.bf16.mxu0 %v408_v33  ;;  %838 = vmatprep.subr.bf16.mxu1 %v408_v33 }
  0x4b   : > { %811 = vmatpush3.bf16.msra.mxu0 %v408_v33  ;;  %846 = vmatpush3.bf16.msra.mxu1 %v408_v33 }
  0x4c   : > { %812 = vmatprep.subr.bf16.mxu0 %v409_v36  ;;  %839 = vmatprep.subr.bf16.mxu1 %v409_v36 }
  0x4f   : > { %813 = vmatpush3.bf16.msra.mxu0 %v409_v36  ;;  %847 = vmatpush3.bf16.msra.mxu1 %v409_v36 }
  0x50   : > { %814 = vmatprep.subr.bf16.mxu0 %v410_v39  ;;  %840 = vmatprep.subr.bf16.mxu1 %v410_v39 }
  0x53   : > { %815 = vmatpush3.bf16.msra.mxu0 %v410_v39  ;;  %848 = vmatpush3.bf16.msra.mxu1 %v410_v39  ;;  %v611_v39 = vld [vmem:[%s1083_s29 + $0x10] sm:$0xff] (!%p782_p13) }
  0x54   : > { %816 = vmatprep.subr.bf16.mxu0 %v411_v42  ;;  %841 = vmatprep.subr.bf16.mxu1 %v411_v42 }
  0x57   : > { %817 = vmatpush3.bf16.msra.mxu0 %v411_v42  ;;  %849 = vmatpush3.bf16.msra.mxu1 %v411_v42 }
  0x5a   : > { %819 = vmatmul.mubr.bf16.vlgmr.msra.gmra.mrb[0].mxu0 %v909_v43  ;;  %827 = vmatmul.mubr.bf16.vlgmr.msra.gmra.mrb[0].mxu1 %v910_v44  ;;  %v612_v43 = vld [vmem:[%s1083_s29 + $0x18] sm:$0xff] (!%p782_p13) }
  0x5b   : > { %822 = vmatprep.mubr.bf16.mxu0 %v911_v45  ;;  %830 = vmatprep.mubr.bf16.mxu1 %v912_v46  ;;  %v613_v46 = vld [vmem:[%s1083_s29 + $0x20] sm:$0xff] (!%p782_p13) }
  0x62   : > { %823 = vmatmul.mubr.bf16.gmra.mrb[4].mxu0 %v913_v47  ;;  %831 = vmatmul.mubr.bf16.gmra.mrb[4].mxu1 %v914_v48  ;;  %v614_v48 = vld [vmem:[%s1083_s29 + $0x28] sm:$0xff] (!%p782_p13) }
 0x12d   : > { %v820_v53 = vpop.f32.mrb[0].mxu0  ;;  %v828_v54 = vpop.f32.mrb[0].mxu1 }
 0x12e   : > { %v559_v57 = vadd.f32 %v820_v53, %v358_v49  ;;  %v567_v58 = vadd.f32 %v828_v54, %v366_v50  ;;  %v494_v59 = vpop.f32.mrb[1].mxu0  ;;  %v526_v60 = vpop.f32.mrb[1].mxu1 }
 0x12f   : > { %v557_v63 = vadd.f32 %v494_v59, %v356_v51  ;;  %v565_v0 = vadd.f32 %v526_v60, %v364_v52  ;;  %v821_v1 = vpop.f32.mrb[2].mxu0  ;;  %v829_v2 = vpop.f32.mrb[2].mxu1  ;;  %v615_v52 = vld [vmem:[%s1083_s29 + $0x30] sm:$0xff] (!%p782_p13) }
 0x130   : > { %575 = vst [vmem:[#allocation2 + $0x10] sm:$0xff] %v559_v57  ;;  %583 = vst [vmem:[#allocation2 + $0x50] sm:$0xff] %v567_v58  ;;  %v560_v3 = vadd.f32 %v821_v1, %v359_v55  ;;  %v568_v4 = vadd.f32 %v829_v2, %v367_v56  ;;  %v497_v5 = vpop.f32.mrb[3].mxu0  ;;  %v529_v6 = vpop.f32.mrb[3].mxu1  ;;  %v616_v55 = vld [vmem:[%s1083_s29 + $0x38] sm:$0xff] (!%p782_p13)  ;;  %v617_v57 = vld [vmem:[%s1083_s29 + $0x40] sm:$0xff] (!%p782_p13) }
 0x131   : > { %573 = vst [vmem:[#allocation2] sm:$0xff] %v557_v63  ;;  %581 = vst [vmem:[#allocation2 + $0x40] sm:$0xff] %v565_v0  ;;  %v558_v7 = vadd.f32 %v497_v5, %v357_v61  ;;  %v566_v8 = vadd.f32 %v529_v6, %v365_v62  ;;  %v618_v61 = vld [vmem:[%s1083_s29 + $0x48] sm:$0xff] (!%p782_p13)  ;;  %v619_v0 = vld [vmem:[%s1083_s29 + $0x50] sm:$0xff] (!%p782_p13) }
 0x132   : > { %576 = vst [vmem:[#allocation2 + $0x18] sm:$0xff] %v560_v3  ;;  %584 = vst [vmem:[#allocation2 + $0x58] sm:$0xff] %v568_v4  ;;  %v620_v2 = vld [vmem:[%s1083_s29 + $0x58] sm:$0xff] (!%p782_p13)  ;;  %v621_v6 = vld [vmem:[%s1083_s29 + $0x60] sm:$0xff] (!%p782_p13) }
 0x133   : > { %574 = vst [vmem:[#allocation2 + $0x8] sm:$0xff] %v558_v7  ;;  %582 = vst [vmem:[#allocation2 + $0x48] sm:$0xff] %v566_v8 }
 0x135   : > { %v824_v13 = vpop.f32.mrb[4].mxu0  ;;  %v832_v14 = vpop.f32.mrb[4].mxu1  ;;  %592 = sbr.rel (%p782_p13) target bundleno = 327 (0x147), region = 81 }
 0x136   : > { %v563_v17 = vadd.f32 %v824_v13, %v362_v9  ;;  %v571_v18 = vadd.f32 %v832_v14, %v370_v10  ;;  %v510_v19 = vpop.f32.mrb[5].mxu0  ;;  %v542_v20 = vpop.f32.mrb[5].mxu1  ;;  %v622_v9 = vld [vmem:[%s1083_s29 + $0x68] sm:$0xff] (!%p782_p13) }
 0x137   : > { %v561_v23 = vadd.f32 %v510_v19, %v360_v11  ;;  %v569_v24 = vadd.f32 %v542_v20, %v368_v12  ;;  %v825_v25 = vpop.f32.mrb[6].mxu0  ;;  %v833_v26 = vpop.f32.mrb[6].mxu1  ;;  %v595_v38 = vld [vmem:[#allocation2 + $0x10] sm:$0xff] (!%p782_p13) }
 0x138   : > { %579 = vst [vmem:[#allocation2 + $0x30] sm:$0xff] %v563_v17  ;;  %587 = vst [vmem:[#allocation2 + $0x70] sm:$0xff] %v571_v18  ;;  %v564_v27 = vadd.f32 %v825_v25, %v363_v15  ;;  %v572_v28 = vadd.f32 %v833_v26, %v371_v16  ;;  %v513_v29 = vpop.f32.mrb[7].mxu0  ;;  %v545_v30 = vpop.f32.mrb[7].mxu1  ;;  %v593_v33 = vld [vmem:[#allocation2] sm:$0xff] (!%p782_p13)  ;;  %v627_v41 = vadd.f32 (!%p782_p13), %v611_v39, %v595_v38  ;;  %v603_v62 = vld [vmem:[#allocation2 + $0x50] sm:$0xff] (!%p782_p13) }
 0x139   : > { %577 = vst [vmem:[#allocation2 + $0x20] sm:$0xff] %v561_v23  ;;  %585 = vst [vmem:[#allocation2 + $0x60] sm:$0xff] %v569_v24  ;;  %v562_v31 = vadd.f32 %v513_v29, %v361_v21  ;;  %v570_v32 = vadd.f32 %v545_v30, %v369_v22  ;;  %v625_v36 = vadd.f32 (!%p782_p13), %v609_v34, %v593_v33  ;;  %v596_v42 = vld [vmem:[#allocation2 + $0x18] sm:$0xff] (!%p782_p13)  ;;  %v601_v56 = vld [vmem:[#allocation2 + $0x40] sm:$0xff] (!%p782_p13) }
 0x13a   : > { %580 = vst [vmem:[#allocation2 + $0x38] sm:$0xff] %v564_v27  ;;  %588 = vst [vmem:[#allocation2 + $0x78] sm:$0xff] %v572_v28  ;;  %v594_v35 = vld [vmem:[#allocation2 + $0x8] sm:$0xff] (!%p782_p13)  ;;  %v628_v45 = vadd.f32 (!%p782_p13), %v612_v43, %v596_v42  ;;  %v633_v59 = vadd.f32 (!%p782_p13), %v617_v57, %v601_v56  ;;  %v604_v1 = vld [vmem:[#allocation2 + $0x58] sm:$0xff] (!%p782_p13)  ;;  %v635_v3 = vadd.f32 (!%p782_p13), %v619_v0, %v603_v62 }
 0x13b   : > { %578 = vst [vmem:[#allocation2 + $0x28] sm:$0xff] %v562_v31  ;;  %586 = vst [vmem:[#allocation2 + $0x68] sm:$0xff] %v570_v32  ;;  %v626_v40 = vadd.f32 (!%p782_p13), %v610_v37, %v594_v35  ;;  %v602_v60 = vld [vmem:[#allocation2 + $0x48] sm:$0xff] (!%p782_p13)  ;;  %v636_v4 = vadd.f32 (!%p782_p13), %v620_v2, %v604_v1  ;;  %v623_v11 = vld [vmem:[%s1083_s29 + $0x70] sm:$0xff] (!%p782_p13) }
 0x13c   : > { %641 = vst [vmem:[%s1088_s4] sm:$0xff] %v625_v36  ;;  %643 = vst [vmem:[%s1088_s4 + $0x10] sm:$0xff] %v627_v41  ;;  %v634_v63 = vadd.f32 %v618_v61, %v602_v60  ;;  %v624_v15 = vld [vmem:[%s1083_s29 + $0x78] sm:$0xff] }
 0x13d   : > { %642 = vst [vmem:[%s1088_s4 + $0x8] sm:$0xff] %v626_v40  ;;  %644 = vst [vmem:[%s1088_s4 + $0x18] sm:$0xff] %v628_v45 }
 0x13e   : > { %649 = vst [vmem:[%s1088_s4 + $0x40] sm:$0xff] %v633_v59  ;;  %650 = vst [vmem:[%s1088_s4 + $0x48] sm:$0xff] %v634_v63 }
 0x13f   : > { %v599_v51 = vld [vmem:[#allocation2 + $0x30] sm:$0xff]  ;;  %651 = vst [vmem:[%s1088_s4 + $0x50] sm:$0xff] %v635_v3  ;;  %652 = vst [vmem:[%s1088_s4 + $0x58] sm:$0xff] %v636_v4 }
 0x140   : > { %v597_v44 = vld [vmem:[#allocation2 + $0x20] sm:$0xff]  ;;  %v631_v54 = vadd.f32 %v615_v52, %v599_v51  ;;  %v607_v10 = vld [vmem:[#allocation2 + $0x70] sm:$0xff] }
 0x141   : > { %v629_v49 = vadd.f32 %v613_v46, %v597_v44  ;;  %v600_v53 = vld [vmem:[#allocation2 + $0x38] sm:$0xff]  ;;  %v605_v5 = vld [vmem:[#allocation2 + $0x60] sm:$0xff]  ;;  %v639_v13 = vadd.f32 %v623_v11, %v607_v10 }
 0x142   : > { %v598_v47 = vld [vmem:[#allocation2 + $0x28] sm:$0xff]  ;;  %v632_v58 = vadd.f32 %v616_v55, %v600_v53  ;;  %647 = vst [vmem:[%s1088_s4 + $0x30] sm:$0xff] %v631_v54  ;;  %v637_v8 = vadd.f32 %v621_v6, %v605_v5  ;;  %v608_v14 = vld [vmem:[#allocation2 + $0x78] sm:$0xff] }
 0x143   : > { %v630_v50 = vadd.f32 %v614_v48, %v598_v47  ;;  %645 = vst [vmem:[%s1088_s4 + $0x20] sm:$0xff] %v629_v49  ;;  %v606_v7 = vld [vmem:[#allocation2 + $0x68] sm:$0xff]  ;;  %v640_v16 = vadd.f32 %v624_v15, %v608_v14  ;;  %655 = vst [vmem:[%s1088_s4 + $0x70] sm:$0xff] %v639_v13 }
 0x144   : > { %648 = vst [vmem:[%s1088_s4 + $0x38] sm:$0xff] %v632_v58  ;;  %v638_v12 = vadd.f32 %v622_v9, %v606_v7  ;;  %653 = vst [vmem:[%s1088_s4 + $0x60] sm:$0xff] %v637_v8 }
 0x145   : > { %646 = vst [vmem:[%s1088_s4 + $0x28] sm:$0xff] %v630_v50  ;;  %656 = vst [vmem:[%s1088_s4 + $0x78] sm:$0xff] %v640_v16 }
 0x146   : > { %654 = vst [vmem:[%s1088_s4 + $0x68] sm:$0xff] %v638_v12 }
 0x147 PF: > { %s13_s18 = sadd.s32 1, %s969_s18   ;;  %s1175_s12 = smov %s949_s13 }
 0x148   : > { %p10_p0 = scmp.ge.s32.totalorder %s13_s18, 6   ;;  %s1176_s13 = smov %s1043_s25 }
 0x149   : > { %s1177_s14 = smov %s961_s16  ;;  %s1178_s15 = smov %s965_s17 }
 0x14a   : > { %s1179_s16 = smov %s1182_s19  ;;  %s1180_s17 = smov %s1186_s20 }
 0x14b   :  { %12 = sbr.rel (!%p10_p0) target bundleno = 4 (0x4), region = 122 }

// kernel: graph_conv_forward.5
= control target key start
LH: loop header
LB: loop body
LE: loop exit
PB: predicated region body
PF: predicated region fallthrough
CT: control target
= control target key end

     0   :  { %s1008_s12 = smov 0   ;;  %s1010_s13 = smov 0   ;;  %s1187_s0 = inlined_call_operand.vmem [shape: bf16[256,256], index: 0, kind: input, shape index: {}]   ;;  %s1188_s1 = inlined_call_operand.vmem [shape: f32[256,128], index: 1, kind: input, shape index: {}]   ;;  %s1189_s2 = inlined_call_operand.vmem [shape: f32[256,128], index: 2, kind: input, shape index: {}]   ;;  %s1190_s3 = inlined_call_operand.vmem [shape: f32[256,128], index: 3, kind: output, shape index: {}]  }
   0x1   :  { %s1012_s14 = smov 0   ;;  %s1014_s15 = smov 0  }
   0x2   :  { %s1016_s16 = smov 0   ;;  %s1018_s17 = smov 0  }
   0x3   :  { %s1020_s18 = smov 0  }
   0x4 LB: > { %s22_s19 = sadd.s32 1, %s977_s16  ;;  %s25_s20 = sadd.s32 1, %s981_s17  ;;  %s985_s18 = sphi %s1020_s18, %s13_s18   ;;  %s981_s17 = sphi %s1018_s17, %s1196_s17   ;;  %s977_s16 = sphi %s1016_s16, %s1195_s16   ;;  %s973_s15 = sphi %s1014_s15, %s1194_s15   ;;  %s969_s14 = sphi %s1012_s14, %s1193_s14   ;;  %s965_s13 = sphi %s1010_s13, %s1192_s13   ;;  %s961_s12 = sphi %s1008_s12, %s1191_s12  }
   0x5   : > { %p23_p0 = scmp.ge.s32.totalorder %s22_s19, 2  ;;  %p41_p1 = scmp.ne.s32.totalorder %s965_s13, %s961_s12 }
   0x6   : > { %p42_p2 = scmp.eq.s32.totalorder %s985_s18, 0  ;;  %s34_s24 = sadd.s32 1, %s965_s13 }
   0x7   : > { %s1198_s19 = smov (%p23_p0, %s22_s19), 0  ;;  %s1200_s20 = smov (!%p23_p0, %s25_s20), %s981_s17 }
   0x8   : > { %p43_p3 = por %p42_p2, %p41_p1  ;;  %p27_p4 = scmp.ge.s32.totalorder %s1200_s20, 2 }
   0x9   : > { %s30_s21 = ssub.s32 %s977_s16, %s1198_s19  ;;  %p776_p6 = scmp.ge.s32.totalorder %s985_s18, 4 }
   0xa   : > { %s1202_s20 = smov (%p27_p4, %s1200_s20), 0 }
   0xb   : > { %s29_s22 = ssub.s32 %s981_s17, %s1202_s20  ;;  %145 = sbr.rel (%p776_p6) target bundleno = 34 (0x22), region = 16 }
   0xc   : > { %s31_s23 = sor.u32 %s30_s21, %s29_s22 }
   0xd   : > { %p32_p5 = scmp.eq.s32.totalorder %s31_s23, 0 }
   0xf   : > { %s1059_s25 = scalar_select %p32_p5, %s965_s13, %s34_s24  }
  0x12   : > { %148 = sbr.rel (!%p43_p3) target bundleno = 34 (0x22), region = 20  ;;  %s150_s26 = sand.u32 (%p43_p3), 1, %s965_s13  }
  0x13   : > { %s801_s27 = sshll.u32 (%p43_p3), %s981_s17, 5  ;;  %s777_s28 = sshll.u32 (%p43_p3), %s150_s26, 6 }
  0x14   : > { %s155_s29 = sadd.s32 (%p43_p3), %s977_s16, %s801_s27  ;;  %s152_s7 = scalar_lea.vmem (%p43_p3), [#allocation3], %s777_s28 }
  0x15   : > { %s780_s30 = sshll.u32 (%p43_p3), %s155_s29, 2 }
  0x16   : > { %s1068_s6 = scalar_lea.vmem (%p43_p3), %s1187_s0, %s780_s30 }
  0x17   : > { %v173_v0 = vld [vmem:[%s1068_s6] sm:$0xf] (%p43_p3)  ;;  %v175_v1 = vld [vmem:[%s1068_s6 + $0x8] sm:$0xf] (%p43_p3)  ;;  %v177_v2 = vld [vmem:[%s1068_s6 + $0x10] sm:$0xf] (%p43_p3) }
  0x18   : > { %174 = vst [vmem:[%s152_s7] sm:$0xf] (%p43_p3), %v173_v0  ;;  %176 = vst [vmem:[%s152_s7 + $0x4] sm:$0xf] (%p43_p3), %v175_v1  ;;  %v179_v3 = vld [vmem:[%s1068_s6 + $0x18] sm:$0xf] (%p43_p3) }
  0x19   : > { %178 = vst [vmem:[%s152_s7 + $0x8] sm:$0xf] %v177_v2  ;;  %v181_v4 = vld [vmem:[%s1068_s6 + $0x20] sm:$0xf]  ;;  %v183_v5 = vld [vmem:[%s1068_s6 + $0x28] sm:$0xf] }
  0x1a   : > { %180 = vst [vmem:[%s152_s7 + $0xc] sm:$0xf] %v179_v3  ;;  %182 = vst [vmem:[%s152_s7 + $0x10] sm:$0xf] %v181_v4  ;;  %v185_v6 = vld [vmem:[%s1068_s6 + $0x30] sm:$0xf] }
  0x1b   : > { %184 = vst [vmem:[%s152_s7 + $0x14] sm:$0xf] %v183_v5  ;;  %v187_v7 = vld [vmem:[%s1068_s6 + $0x38] sm:$0xf]  ;;  %v189_v8 = vld [vmem:[%s1068_s6 + $0x40] sm:$0xf] }
  0x1c   : > { %186 = vst [vmem:[%s152_s7 + $0x18] sm:$0xf] %v185_v6  ;;  %188 = vst [vmem:[%s152_s7 + $0x1c] sm:$0xf] %v187_v7  ;;  %v191_v9 = vld [vmem:[%s1068_s6 + $0x48] sm:$0xf] }
  0x1d   : > { %190 = vst [vmem:[%s152_s7 + $0x20] sm:$0xf] %v189_v8  ;;  %v193_v10 = vld [vmem:[%s1068_s6 + $0x50] sm:$0xf]  ;;  %v195_v11 = vld [vmem:[%s1068_s6 + $0x58] sm:$0xf] }
  0x1e   : > { %192 = vst [vmem:[%s152_s7 + $0x24] sm:$0xf] %v191_v9  ;;  %194 = vst [vmem:[%s152_s7 + $0x28] sm:$0xf] %v193_v10  ;;  %v197_v12 = vld [vmem:[%s1068_s6 + $0x60] sm:$0xf] }
  0x1f   : > { %196 = vst [vmem:[%s152_s7 + $0x2c] sm:$0xf] %v195_v11  ;;  %v199_v13 = vld [vmem:[%s1068_s6 + $0x68] sm:$0xf]  ;;  %v201_v14 = vld [vmem:[%s1068_s6 + $0x70] sm:$0xf] }
  0x20   : > { %198 = vst [vmem:[%s152_s7 + $0x30] sm:$0xf] %v197_v12  ;;  %200 = vst [vmem:[%s152_s7 + $0x34] sm:$0xf] %v199_v13  ;;  %v203_v15 = vld [vmem:[%s1068_s6 + $0x78] sm:$0xf] }
  0x21   : > { %202 = vst [vmem:[%s152_s7 + $0x38] sm:$0xf] %v201_v14  ;;  %204 = vst [vmem:[%s152_s7 + $0x3c] sm:$0xf] %v203_v15 }
  0x22 PF: > { %p781_p7 = scmp.ge.s32.totalorder %s985_s18, 1  ;;  %p276_p8 = scmp.lt.s32.totalorder %s985_s18, 5 }
  0x24   : > { %p277_p9 = pnand %p781_p7, %p276_p8 }
  0x25   : > { %s283_s8 = sand.u32 (!%p277_p9), 1, %s961_s12   ;;  %s783_s9 = sshll.u32 (!%p277_p9), %s969_s14, 4 }
  0x26   : > { %280 = sbr.rel (%p277_p9) target bundleno = 329 (0x149), region = 69  ;;  %s782_s10 = sshll.u32 (!%p277_p9), %s283_s8, 6 }
  0x27   : > { %p318_p10 = scmp.lt.s32.totalorder (!%p277_p9), %s783_s9, 31  ;;  %s785_s11 = sshll.u32 (!%p277_p9), %s973_s15, 4 }
  0x28   : > { %p324_p11 = scmp.lt.s32.totalorder (!%p277_p9), %s785_s11, 31  ;;  %s1106_s15 = scalar_lea.vmem (!%p277_p9), [#allocation3], %s782_s10 }
  0x29   : > { %p789_p12 = scmp.ne.s32.totalorder (!%p277_p9), %s969_s14, 0 }
  0x2d   : > { %s1204_s9 = smov (!%p318_p10, %s783_s9), 31  ;;  %s1206_s11 = smov (!%p324_p11, %s785_s11), 31 }
  0x2e   : > { %s784_s21 = sshll.u32 %s1204_s9, 3  ;;  %s786_s26 = sshll.u32 %s1206_s11, 3  ;;  %v987_v16 = vmov (!%p789_p12), 0.0  }
  0x2f   : > { %s1094_s24 = scalar_lea.vmem %s1188_s1, %s784_s21  ;;  %s1099_s29 = scalar_lea.vmem %s1189_s2, %s786_s26  ;;  %340 = vst [vmem:[#allocation2] sm:$0xff] (!%p789_p12), %v987_v16  ;;  %341 = vst [vmem:[#allocation2 + $0x8] sm:$0xff] (!%p789_p12), %v987_v16 }
  0x30   : > { %s1104_s4 = scalar_lea.vmem %s1190_s3, %s786_s26  ;;  %339 = sbr.rel (%p789_p12) target bundleno = 55 (0x37), region = 77  ;;  %342 = vst [vmem:[#allocation2 + $0x10] sm:$0xff] (!%p789_p12), %v987_v16  ;;  %343 = vst [vmem:[#allocation2 + $0x18] sm:$0xff] (!%p789_p12), %v987_v16 }
  0x31   : > { %344 = vst [vmem:[#allocation2 + $0x20] sm:$0xff] (!%p789_p12), %v987_v16  ;;  %345 = vst [vmem:[#allocation2 + $0x28] sm:$0xff] (!%p789_p12), %v987_v16 }
  0x32   : > { %346 = vst [vmem:[#allocation2 + $0x30] sm:$0xff] (!%p789_p12), %v987_v16  ;;  %347 = vst [vmem:[#allocation2 + $0x38] sm:$0xff] (!%p789_p12), %v987_v16 }
  0x33   : > { %348 = vst [vmem:[#allocation2 + $0x40] sm:$0xff] (!%p789_p12), %v987_v16  ;;  %349 = vst [vmem:[#allocation2 + $0x48] sm:$0xff] (!%p789_p12), %v987_v16 }
  0x34   : > { %350 = vst [vmem:[#allocation2 + $0x50] sm:$0xff] (!%p789_p12), %v987_v16  ;;  %351 = vst [vmem:[#allocation2 + $0x58] sm:$0xff] (!%p789_p12), %v987_v16 }
  0x35   : > { %352 = vst [vmem:[#allocation2 + $0x60] sm:$0xff] (!%p789_p12), %v987_v16  ;;  %353 = vst [vmem:[#allocation2 + $0x68] sm:$0xff] (!%p789_p12), %v987_v16 }
  0x36   : > { %354 = vst [vmem:[#allocation2 + $0x70] sm:$0xff] (!%p789_p12), %v987_v16  ;;  %355 = vst [vmem:[#allocation2 + $0x78] sm:$0xff] (!%p789_p12), %v987_v16 }
  0x37 PF: > { %v388_v17 = vld [vmem:[%s1094_s24] sm:$0xff]  ;;  %v389_v18 = vld [vmem:[%s1094_s24 + $0x8] sm:$0xff]  ;;  %v390_v19 = vld [vmem:[%s1094_s24 + $0x10] sm:$0xff]  ;;  %p798_p13 = scmp.ne.s32.totalorder %s969_s14, 1 }
  0x38   : > { %v404_v20 = vpack.c.bf16 %v389_v18, %v388_v17  ;;  %v391_v21 = vld [vmem:[%s1094_s24 + $0x18] sm:$0xff]  ;;  %v392_v23 = vld [vmem:[%s1094_s24 + $0x20] sm:$0xff]  ;;  %v393_v24 = vld [vmem:[%s1094_s24 + $0x28] sm:$0xff] }
  0x39   : > { %v405_v22 = vpack.c.bf16 %v391_v21, %v390_v19  ;;  %v394_v25 = vld [vmem:[%s1094_s24 + $0x30] sm:$0xff]  ;;  %v406_v26 = vpack.c.bf16 %v393_v24, %v392_v23  ;;  %v395_v27 = vld [vmem:[%s1094_s24 + $0x38] sm:$0xff]  ;;  %v923_v28 = vld [vmem:[%s1106_s15] sm:$0xff]  }
  0x3a   : > { %818 = vmatprep.subr.bf16.mxu0 %v404_v20  ;;  %850 = vmatprep.subr.bf16.mxu1 %v404_v20  ;;  %v924_v29 = vld [vmem:[%s1106_s15 + $0x20] sm:$0xff]   ;;  %v407_v30 = vpack.c.bf16 %v395_v27, %v394_v25  ;;  %v397_v32 = vld [vmem:[%s1094_s24 + $0x48] sm:$0xff]  ;;  %v398_v34 = vld [vmem:[%s1094_s24 + $0x50] sm:$0xff] }
  0x3b   : > { %819 = vmatpush3.bf16.msra.mxu0 %v404_v20  ;;  %858 = vmatpush3.bf16.msra.mxu1 %v404_v20  ;;  %v396_v31 = vld [vmem:[%s1094_s24 + $0x40] sm:$0xff]  ;;  %v399_v35 = vld [vmem:[%s1094_s24 + $0x58] sm:$0xff]  ;;  %v401_v38 = vld [vmem:[%s1094_s24 + $0x68] sm:$0xff] }
  0x3c   : > { %820 = vmatprep.subr.bf16.mxu0 %v405_v22  ;;  %851 = vmatprep.subr.bf16.mxu1 %v405_v22  ;;  %v408_v33 = vpack.c.bf16 %v397_v32, %v396_v31  ;;  %v409_v36 = vpack.c.bf16 %v399_v35, %v398_v34  ;;  %v400_v37 = vld [vmem:[%s1094_s24 + $0x60] sm:$0xff]  ;;  %v402_v40 = vld [vmem:[%s1094_s24 + $0x70] sm:$0xff]  ;;  %v403_v41 = vld [vmem:[%s1094_s24 + $0x78] sm:$0xff] }
  0x3d   : > { %834 = vmatprep.mubr.bf16.mxu0 %v923_v28  ;;  %842 = vmatprep.mubr.bf16.mxu1 %v924_v29  ;;  %v410_v39 = vpack.c.bf16 %v401_v38, %v400_v37  ;;  %v411_v42 = vpack.c.bf16 %v403_v41, %v402_v40  ;;  %v925_v43 = vld [vmem:[%s1106_s15 + $0x8] sm:$0xff]   ;;  %v927_v45 = vld [vmem:[%s1106_s15 + $0x10] sm:$0xff]   ;;  %v929_v47 = vld [vmem:[%s1106_s15 + $0x18] sm:$0xff]  }
  0x3e   : > { %v926_v44 = vld [vmem:[%s1106_s15 + $0x28] sm:$0xff]   ;;  %v928_v46 = vld [vmem:[%s1106_s15 + $0x30] sm:$0xff]   ;;  %v930_v48 = vld [vmem:[%s1106_s15 + $0x38] sm:$0xff]  }
  0x3f   : > { %821 = vmatpush3.bf16.msra.mxu0 %v405_v22  ;;  %859 = vmatpush3.bf16.msra.mxu1 %v405_v22  ;;  %v358_v49 = vld [vmem:[#allocation2 + $0x10] sm:$0xff]  ;;  %v356_v51 = vld [vmem:[#allocation2] sm:$0xff]  ;;  %v359_v55 = vld [vmem:[#allocation2 + $0x18] sm:$0xff] }
  0x40   : > { %822 = vmatprep.subr.bf16.mxu0 %v406_v26  ;;  %852 = vmatprep.subr.bf16.mxu1 %v406_v26  ;;  %v366_v50 = vld [vmem:[#allocation2 + $0x50] sm:$0xff]  ;;  %v364_v52 = vld [vmem:[#allocation2 + $0x40] sm:$0xff]  ;;  %v367_v56 = vld [vmem:[#allocation2 + $0x58] sm:$0xff] }
  0x41   : > { %v357_v61 = vld [vmem:[#allocation2 + $0x8] sm:$0xff]  ;;  %v362_v9 = vld [vmem:[#allocation2 + $0x30] sm:$0xff]  ;;  %v360_v11 = vld [vmem:[#allocation2 + $0x20] sm:$0xff] }
  0x42   : > { %v365_v62 = vld [vmem:[#allocation2 + $0x48] sm:$0xff]  ;;  %v370_v10 = vld [vmem:[#allocation2 + $0x70] sm:$0xff]  ;;  %v368_v12 = vld [vmem:[#allocation2 + $0x60] sm:$0xff] }
  0x43   : > { %823 = vmatpush3.bf16.msra.mxu0 %v406_v26  ;;  %860 = vmatpush3.bf16.msra.mxu1 %v406_v26  ;;  %v363_v15 = vld [vmem:[#allocation2 + $0x38] sm:$0xff]  ;;  %v361_v21 = vld [vmem:[#allocation2 + $0x28] sm:$0xff]  ;;  %v609_v34 = vld [vmem:[%s1099_s29] sm:$0xff] (!%p798_p13) }
  0x44   : > { %824 = vmatprep.subr.bf16.mxu0 %v407_v30  ;;  %853 = vmatprep.subr.bf16.mxu1 %v407_v30  ;;  %v371_v16 = vld [vmem:[#allocation2 + $0x78] sm:$0xff]  ;;  %v369_v22 = vld [vmem:[#allocation2 + $0x68] sm:$0xff] }
  0x45   : > { %v610_v37 = vld [vmem:[%s1099_s29 + $0x8] sm:$0xff] (!%p798_p13) }
  0x47   : > { %825 = vmatpush3.bf16.msra.mxu0 %v407_v30  ;;  %861 = vmatpush3.bf16.msra.mxu1 %v407_v30 }
  0x48   : > { %826 = vmatprep.subr.bf16.mxu0 %v408_v33  ;;  %854 = vmatprep.subr.bf16.mxu1 %v408_v33 }
  0x4b   : > { %827 = vmatpush3.bf16.msra.mxu0 %v408_v33  ;;  %862 = vmatpush3.bf16.msra.mxu1 %v408_v33 }
  0x4c   : > { %828 = vmatprep.subr.bf16.mxu0 %v409_v36  ;;  %855 = vmatprep.subr.bf16.mxu1 %v409_v36 }
  0x4f   : > { %829 = vmatpush3.bf16.msra.mxu0 %v409_v36  ;;  %863 = vmatpush3.bf16.msra.mxu1 %v409_v36 }
  0x50   : > { %830 = vmatprep.subr.bf16.mxu0 %v410_v39  ;;  %856 = vmatprep.subr.bf16.mxu1 %v410_v39 }
  0x53   : > { %831 = vmatpush3.bf16.msra.mxu0 %v410_v39  ;;  %864 = vmatpush3.bf16.msra.mxu1 %v410_v39  ;;  %v611_v39 = vld [vmem:[%s1099_s29 + $0x10] sm:$0xff] (!%p798_p13) }
  0x54   : > { %832 = vmatprep.subr.bf16.mxu0 %v411_v42  ;;  %857 = vmatprep.subr.bf16.mxu1 %v411_v42 }
  0x57   : > { %833 = vmatpush3.bf16.msra.mxu0 %v411_v42  ;;  %865 = vmatpush3.bf16.msra.mxu1 %v411_v42 }
  0x5a   : > { %835 = vmatmul.mubr.bf16.vlgmr.msra.gmra.mrb[0].mxu0 %v925_v43  ;;  %843 = vmatmul.mubr.bf16.vlgmr.msra.gmra.mrb[0].mxu1 %v926_v44  ;;  %v612_v43 = vld [vmem:[%s1099_s29 + $0x18] sm:$0xff] (!%p798_p13) }
  0x5b   : > { %838 = vmatprep.mubr.bf16.mxu0 %v927_v45  ;;  %846 = vmatprep.mubr.bf16.mxu1 %v928_v46 }
  0x62   : > { %839 = vmatmul.mubr.bf16.gmra.mrb[4].mxu0 %v929_v47  ;;  %847 = vmatmul.mubr.bf16.gmra.mrb[4].mxu1 %v930_v48  ;;  %v613_v47 = vld [vmem:[%s1099_s29 + $0x20] sm:$0xff] (!%p798_p13) }
 0x12d   : > { %v836_v53 = vpop.f32.mrb[0].mxu0  ;;  %v844_v54 = vpop.f32.mrb[0].mxu1 }
 0x12e   : > { %v559_v57 = vadd.f32 %v836_v53, %v358_v49  ;;  %v567_v58 = vadd.f32 %v844_v54, %v366_v50  ;;  %v494_v59 = vpop.f32.mrb[1].mxu0  ;;  %v526_v60 = vpop.f32.mrb[1].mxu1  ;;  %v614_v49 = vld [vmem:[%s1099_s29 + $0x28] sm:$0xff] (!%p798_p13) }
 0x12f   : > { %v557_v63 = vadd.f32 %v494_v59, %v356_v51  ;;  %v565_v0 = vadd.f32 %v526_v60, %v364_v52  ;;  %v837_v1 = vpop.f32.mrb[2].mxu0  ;;  %v845_v2 = vpop.f32.mrb[2].mxu1  ;;  %v616_v59 = vld [vmem:[%s1099_s29 + $0x38] sm:$0xff] (!%p798_p13) }
 0x130   : > { %575 = vst [vmem:[#allocation2 + $0x10] sm:$0xff] %v559_v57  ;;  %583 = vst [vmem:[#allocation2 + $0x50] sm:$0xff] %v567_v58  ;;  %v560_v3 = vadd.f32 %v837_v1, %v359_v55  ;;  %v568_v4 = vadd.f32 %v845_v2, %v367_v56  ;;  %v497_v5 = vpop.f32.mrb[3].mxu0  ;;  %v529_v6 = vpop.f32.mrb[3].mxu1  ;;  %v615_v55 = vld [vmem:[%s1099_s29 + $0x30] sm:$0xff] (!%p798_p13) }
 0x131   : > { %573 = vst [vmem:[#allocation2] sm:$0xff] %v557_v63  ;;  %581 = vst [vmem:[#allocation2 + $0x40] sm:$0xff] %v565_v0  ;;  %v558_v7 = vadd.f32 %v497_v5, %v357_v61  ;;  %v566_v8 = vadd.f32 %v529_v6, %v365_v62  ;;  %v617_v61 = vld [vmem:[%s1099_s29 + $0x40] sm:$0xff] (!%p798_p13) }
 0x132   : > { %576 = vst [vmem:[#allocation2 + $0x18] sm:$0xff] %v560_v3  ;;  %584 = vst [vmem:[#allocation2 + $0x58] sm:$0xff] %v568_v4  ;;  %v618_v3 = vld [vmem:[%s1099_s29 + $0x48] sm:$0xff] (!%p798_p13) }
 0x133   : > { %574 = vst [vmem:[#allocation2 + $0x8] sm:$0xff] %v558_v7  ;;  %582 = vst [vmem:[#allocation2 + $0x48] sm:$0xff] %v566_v8  ;;  %v619_v7 = vld [vmem:[%s1099_s29 + $0x50] sm:$0xff] (!%p798_p13) }
 0x135   : > { %v840_v13 = vpop.f32.mrb[4].mxu0  ;;  %v848_v14 = vpop.f32.mrb[4].mxu1  ;;  %592 = sbr.rel (%p798_p13) target bundleno = 329 (0x149), region = 81 }
 0x136   : > { %v563_v17 = vadd.f32 %v840_v13, %v362_v9  ;;  %v571_v18 = vadd.f32 %v848_v14, %v370_v10  ;;  %v510_v19 = vpop.f32.mrb[5].mxu0  ;;  %v542_v20 = vpop.f32.mrb[5].mxu1  ;;  %v620_v9 = vld [vmem:[%s1099_s29 + $0x58] sm:$0xff] (!%p798_p13) }
 0x137   : > { %v561_v23 = vadd.f32 %v510_v19, %v360_v11  ;;  %v569_v24 = vadd.f32 %v542_v20, %v368_v12  ;;  %v841_v25 = vpop.f32.mrb[6].mxu0  ;;  %v849_v26 = vpop.f32.mrb[6].mxu1  ;;  %v595_v38 = vld [vmem:[#allocation2 + $0x10] sm:$0xff] (!%p798_p13)  ;;  %v622_v19 = vld [vmem:[%s1099_s29 + $0x68] sm:$0xff] (!%p798_p13) }
 0x138   : > { %579 = vst [vmem:[#allocation2 + $0x30] sm:$0xff] %v563_v17  ;;  %587 = vst [vmem:[#allocation2 + $0x70] sm:$0xff] %v571_v18  ;;  %v564_v27 = vadd.f32 %v841_v25, %v363_v15  ;;  %v572_v28 = vadd.f32 %v849_v26, %v371_v16  ;;  %v513_v29 = vpop.f32.mrb[7].mxu0  ;;  %v545_v30 = vpop.f32.mrb[7].mxu1  ;;  %v593_v33 = vld [vmem:[#allocation2] sm:$0xff] (!%p798_p13)  ;;  %v627_v41 = vadd.f32 (!%p798_p13), %v611_v39, %v595_v38  ;;  %v603_v4 = vld [vmem:[#allocation2 + $0x50] sm:$0xff] (!%p798_p13) }
 0x139   : > { %577 = vst [vmem:[#allocation2 + $0x20] sm:$0xff] %v561_v23  ;;  %585 = vst [vmem:[#allocation2 + $0x60] sm:$0xff] %v569_v24  ;;  %v562_v31 = vadd.f32 %v513_v29, %v361_v21  ;;  %v570_v32 = vadd.f32 %v545_v30, %v369_v22  ;;  %v625_v36 = vadd.f32 (!%p798_p13), %v609_v34, %v593_v33  ;;  %v596_v42 = vld [vmem:[#allocation2 + $0x18] sm:$0xff] (!%p798_p13)  ;;  %v601_v60 = vld [vmem:[#allocation2 + $0x40] sm:$0xff] (!%p798_p13) }
 0x13a   : > { %580 = vst [vmem:[#allocation2 + $0x38] sm:$0xff] %v564_v27  ;;  %588 = vst [vmem:[#allocation2 + $0x78] sm:$0xff] %v572_v28  ;;  %v594_v35 = vld [vmem:[#allocation2 + $0x8] sm:$0xff] (!%p798_p13)  ;;  %v628_v46 = vadd.f32 (!%p798_p13), %v612_v43, %v596_v42  ;;  %v643_v51 = vmax.f32 (!%p798_p13), %v627_v41, 0.0  ;;  %v633_v1 = vadd.f32 (!%p798_p13), %v617_v61, %v601_v60  ;;  %v604_v8 = vld [vmem:[#allocation2 + $0x58] sm:$0xff] (!%p798_p13)  ;;  %v635_v12 = vadd.f32 (!%p798_p13), %v619_v7, %v603_v4 }
 0x13b   : > { %578 = vst [vmem:[#allocation2 + $0x28] sm:$0xff] %v562_v31  ;;  %586 = vst [vmem:[#allocation2 + $0x68] sm:$0xff] %v570_v32  ;;  %v626_v40 = vadd.f32 (!%p798_p13), %v610_v37, %v594_v35  ;;  %v641_v45 = vmax.f32 (!%p798_p13), %v625_v36, 0.0  ;;  %v602_v2 = vld [vmem:[#allocation2 + $0x48] sm:$0xff] (!%p798_p13)  ;;  %v636_v13 = vadd.f32 (!%p798_p13), %v620_v9, %v604_v8  ;;  %v621_v15 = vld [vmem:[%s1099_s29 + $0x60] sm:$0xff] (!%p798_p13) }
 0x13c   : > { %v644_v57 = vmax.f32 %v628_v46, 0.0  ;;  %659 = vst [vmem:[%s1104_s4 + $0x10] sm:$0xff] %v643_v51  ;;  %v634_v6 = vadd.f32 %v618_v3, %v602_v2  ;;  %v649_v11 = vmax.f32 %v633_v1, 0.0  ;;  %v623_v21 = vld [vmem:[%s1099_s29 + $0x70] sm:$0xff]  ;;  %v651_v22 = vmax.f32 %v635_v12, 0.0  ;;  %v624_v27 = vld [vmem:[%s1099_s29 + $0x78] sm:$0xff] }
 0x13d   : > { %v642_v50 = vmax.f32 %v626_v40, 0.0  ;;  %657 = vst [vmem:[%s1104_s4] sm:$0xff] %v641_v45  ;;  %v652_v23 = vmax.f32 %v636_v13, 0.0 }
 0x13e   : > { %660 = vst [vmem:[%s1104_s4 + $0x18] sm:$0xff] %v644_v57  ;;  %v650_v17 = vmax.f32 %v634_v6, 0.0  ;;  %665 = vst [vmem:[%s1104_s4 + $0x40] sm:$0xff] %v649_v11 }
 0x13f   : > { %v599_v54 = vld [vmem:[#allocation2 + $0x30] sm:$0xff]  ;;  %658 = vst [vmem:[%s1104_s4 + $0x8] sm:$0xff] %v642_v50  ;;  %667 = vst [vmem:[%s1104_s4 + $0x50] sm:$0xff] %v651_v22 }
 0x140   : > { %v597_v44 = vld [vmem:[#allocation2 + $0x20] sm:$0xff]  ;;  %v631_v58 = vadd.f32 %v615_v55, %v599_v54  ;;  %v607_v20 = vld [vmem:[#allocation2 + $0x70] sm:$0xff]  ;;  %666 = vst [vmem:[%s1104_s4 + $0x48] sm:$0xff] %v650_v17  ;;  %668 = vst [vmem:[%s1104_s4 + $0x58] sm:$0xff] %v652_v23 }
 0x141   : > { %v629_v52 = vadd.f32 %v613_v47, %v597_v44  ;;  %v600_v56 = vld [vmem:[#allocation2 + $0x38] sm:$0xff]  ;;  %v605_v14 = vld [vmem:[#allocation2 + $0x60] sm:$0xff]  ;;  %v639_v25 = vadd.f32 %v623_v21, %v607_v20 }
 0x142   : > { %v598_v48 = vld [vmem:[#allocation2 + $0x28] sm:$0xff]  ;;  %v632_v0 = vadd.f32 %v616_v59, %v600_v56  ;;  %v647_v5 = vmax.f32 %v631_v58, 0.0  ;;  %v637_v18 = vadd.f32 %v621_v15, %v605_v14  ;;  %v608_v26 = vld [vmem:[#allocation2 + $0x78] sm:$0xff] }
 0x143   : > { %v630_v53 = vadd.f32 %v614_v49, %v598_v48  ;;  %v645_v62 = vmax.f32 %v629_v52, 0.0  ;;  %v606_v16 = vld [vmem:[#allocation2 + $0x68] sm:$0xff]  ;;  %v640_v29 = vadd.f32 %v624_v27, %v608_v26  ;;  %v655_v31 = vmax.f32 %v639_v25, 0.0 }
 0x144   : > { %v648_v10 = vmax.f32 %v632_v0, 0.0  ;;  %663 = vst [vmem:[%s1104_s4 + $0x30] sm:$0xff] %v647_v5  ;;  %v638_v24 = vadd.f32 %v622_v19, %v606_v16  ;;  %v653_v28 = vmax.f32 %v637_v18, 0.0 }
 0x145   : > { %v646_v63 = vmax.f32 %v630_v53, 0.0  ;;  %661 = vst [vmem:[%s1104_s4 + $0x20] sm:$0xff] %v645_v62  ;;  %v656_v32 = vmax.f32 %v640_v29, 0.0  ;;  %671 = vst [vmem:[%s1104_s4 + $0x70] sm:$0xff] %v655_v31 }
 0x146   : > { %664 = vst [vmem:[%s1104_s4 + $0x38] sm:$0xff] %v648_v10  ;;  %v654_v30 = vmax.f32 %v638_v24, 0.0  ;;  %669 = vst [vmem:[%s1104_s4 + $0x60] sm:$0xff] %v653_v28 }
 0x147   : > { %662 = vst [vmem:[%s1104_s4 + $0x28] sm:$0xff] %v646_v63  ;;  %672 = vst [vmem:[%s1104_s4 + $0x78] sm:$0xff] %v656_v32 }
 0x148   : > { %670 = vst [vmem:[%s1104_s4 + $0x68] sm:$0xff] %v654_v30 }
 0x149 PF: > { %s13_s18 = sadd.s32 1, %s985_s18   ;;  %s1191_s12 = smov %s965_s13 }
 0x14a   : > { %p10_p0 = scmp.ge.s32.totalorder %s13_s18, 6   ;;  %s1192_s13 = smov %s1059_s25 }
 0x14b   : > { %s1193_s14 = smov %s977_s16  ;;  %s1194_s15 = smov %s981_s17 }
 0x14c   : > { %s1195_s16 = smov %s1198_s19  ;;  %s1196_s17 = smov %s1202_s20 }
 0x14d   :  { %12 = sbr.rel (!%p10_p0) target bundleno = 4 (0x4), region = 122 }

</bundles_post_ra>
